<compile_context>
chip_gen: v6e
topology: v6e:2x2x1
jax: 0.10.0
libtpu: 0.0.40
codegen_flags: <defaults>
</compile_context>

<pallas_src>
import math

import jax
import jax.numpy as jnp
import numpy as np
from jax.experimental import pallas as pl
from jax.experimental.pallas import tpu as pltpu


def encoder_gru_kernel(ids_ref, len_ref, table_ref,
                       wih_ref, bih_ref,
                       whh_f_ref, bhh_f_ref,
                       whh_b_ref, bhh_b_ref,
                       out_f_ref, out_b_ref, hid_ref):
    T, B, H = out_f_ref.shape
    TB = T * B
    V = table_ref.shape[0]
    H3 = 3 * H

    # --- Hoisted, MXU-friendly precompute (runs once, outside the recurrence) ---
    # Embedding lookup as iota-compare one-hot + matmul: (T*B, V) @ (V, H).
    onehot = (jax.lax.broadcasted_iota(jnp.int32, (TB, V), 1)
              == ids_ref[...]).astype(jnp.float32)
    emb = jnp.dot(onehot, table_ref[...], preferred_element_type=jnp.float32)   # (TB, H)
    # Fused input-side gates for both directions: (T*B, H) @ (H, 6H) + (1, 6H).
    gi_all = jnp.dot(emb, wih_ref[...],
                     preferred_element_type=jnp.float32) + bih_ref[...]         # (TB, 6H)

    # Hoisted validity mask: valid_f[b, t] = 1.0 if t < length[b] else 0.0.
    valid_f = (jax.lax.broadcasted_iota(jnp.int32, (B, T), 1)
               < len_ref[...]).astype(jnp.float32)                              # (B, T)

    # Recurrent weights / biases loaded into vregs once.
    whh_f = whh_f_ref[...]
    whh_b = whh_b_ref[...]
    bhh_f = bhh_f_ref[...]
    bhh_b = bhh_b_ref[...]

    def gru_step(gi, h, whh, bhh):
        # PyTorch gate order: [r, z, n]; only the hidden-side matmul remains
        # on the serial per-step path.
        gh = jnp.dot(h, whh, preferred_element_type=jnp.float32) + bhh          # (B, 3H)
        r = jax.nn.sigmoid(gi[:, 0:H] + gh[:, 0:H])
        z = jax.nn.sigmoid(gi[:, H:2 * H] + gh[:, H:2 * H])
        n = jnp.tanh(gi[:, 2 * H:3 * H] + r * gh[:, 2 * H:3 * H])
        return (1.0 - z) * n + z * h

    h_f = jnp.zeros((B, H), jnp.float32)
    h_b = jnp.zeros((B, H), jnp.float32)

    # Fully unrolled recurrence; fwd step t and bwd step T-1-t interleaved.
    for i in range(T):
        tf = i
        tb = T - 1 - i

        gi_f = gi_all[tf * B:(tf + 1) * B, 0:H3]
        gi_b = gi_all[tb * B:(tb + 1) * B, H3:2 * H3]

        hf_new = gru_step(gi_f, h_f, whh_f, bhh_f)
        hb_new = gru_step(gi_b, h_b, whh_b, bhh_b)

        m_f = valid_f[:, tf:tf + 1]                      # (B, 1)
        m_b = valid_f[:, tb:tb + 1]                      # (B, 1)

        out_f_ref[tf] = m_f * hf_new                     # padded steps -> 0
        out_b_ref[tb] = m_b * hb_new

        h_f = h_f + m_f * (hf_new - h_f)                 # freeze state past length
        h_b = h_b + m_b * (hb_new - h_b)

    hid_ref[0] = h_f
    hid_ref[1] = h_b


def encoder_rnn_forward(input_seq, input_lengths, params):
    T, B = input_seq.shape
    V, H = params["embedding"].shape

    ids2d = input_seq.reshape(T * B, 1).astype(jnp.int32)
    len2d = input_lengths.astype(jnp.int32).reshape(B, 1)

    # Fused input-side weights for both directions: (H, 6H) / (1, 6H).
    wih_fused = jnp.concatenate([params["w_ih_f"].T, params["w_ih_b"].T], axis=1)
    bih_fused = jnp.concatenate([params["b_ih_f"], params["b_ih_b"]]).reshape(1, -1)

    args = (
        ids2d, len2d, params["embedding"],
        wih_fused, bih_fused,
        params["w_hh_f"].T, params["b_hh_f"].reshape(1, -1),
        params["w_hh_b"].T, params["b_hh_b"].reshape(1, -1),
    )

    out_f, out_b, hidden = pl.pallas_call(
        encoder_gru_kernel,
        out_shape=(jax.ShapeDtypeStruct((T, B, H), jnp.float32),
                   jax.ShapeDtypeStruct((T, B, H), jnp.float32),
                   jax.ShapeDtypeStruct((2, B, H), jnp.float32)),
        in_specs=[pl.BlockSpec(memory_space=pltpu.MemorySpace.VMEM)] * len(args),
        out_specs=(pl.BlockSpec(memory_space=pltpu.MemorySpace.VMEM),
                   pl.BlockSpec(memory_space=pltpu.MemorySpace.VMEM),
                   pl.BlockSpec(memory_space=pltpu.MemorySpace.VMEM)),
        compiler_params=pltpu.CompilerParams(vmem_limit_bytes=32 * 1024 * 1024),
    )(*args)

    outputs = out_f + out_b          # sum of fwd/bwd halves, as the module does
    return outputs, hidden


def init_params(key, vocab_size, hidden_size):
    k = 1.0 / math.sqrt(hidden_size)
    keys = jax.random.split(key, 9)

    def u(kk, shape):
        return jax.random.uniform(kk, shape, jnp.float32, -k, k)

    return {
        "embedding": jax.random.normal(keys[0], (vocab_size, hidden_size), jnp.float32),
        "w_ih_f": u(keys[1], (3 * hidden_size, hidden_size)),
        "w_hh_f": u(keys[2], (3 * hidden_size, hidden_size)),
        "b_ih_f": u(keys[3], (3 * hidden_size,)),
        "b_hh_f": u(keys[4], (3 * hidden_size,)),
        "w_ih_b": u(keys[5], (3 * hidden_size, hidden_size)),
        "w_hh_b": u(keys[6], (3 * hidden_size, hidden_size)),
        "b_ih_b": u(keys[7], (3 * hidden_size,)),
        "b_hh_b": u(keys[8], (3 * hidden_size,)),
    }


def reference_forward(input_seq, input_lengths, params):
    """Pure-JAX reference of the same masked bidirectional GRU semantics."""
    emb = params["embedding"][input_seq]  # (T, B, H)
    T, B, H = emb.shape
    mask = (jnp.arange(T)[:, None] < input_lengths[None, :]).astype(jnp.float32)[..., None]

    def cell(x, h, wih, whh, bih, bhh):
        gi = x @ wih.T + bih
        gh = h @ whh.T + bhh
        r = jax.nn.sigmoid(gi[:, :H] + gh[:, :H])
        z = jax.nn.sigmoid(gi[:, H:2 * H] + gh[:, H:2 * H])
        n = jnp.tanh(gi[:, 2 * H:] + r * gh[:, 2 * H:])
        return (1 - z) * n + z * h

    def make_step(wih, whh, bih, bhh):
        def step(h, xm):
            x, m = xm
            hn = cell(x, h, wih, whh, bih, bhh)
            h_next = m * hn + (1 - m) * h
            return h_next, m * hn
        return step

    h0 = jnp.zeros((B, H), jnp.float32)
    hf, out_f = jax.lax.scan(
        make_step(params["w_ih_f"], params["w_hh_f"], params["b_ih_f"], params["b_hh_f"]),
        h0, (emb, mask))
    hb, out_b_rev = jax.lax.scan(
        make_step(params["w_ih_b"], params["w_hh_b"], params["b_ih_b"], params["b_hh_b"]),
        h0, (emb[::-1], mask[::-1]))
    return out_f + out_b_rev[::-1], jnp.stack([hf, hb])


if __name__ == "__main__":
    V, H, T, B = 20, 32, 8, 4  # small vocab / hidden / seq / batch (B*H = 128)

    params = init_params(jax.random.PRNGKey(0), V, H)

    # Descending lengths (pack_padded_sequence's default requirement).
    input_lengths = jnp.array([8, 6, 5, 3], dtype=jnp.int32)
    ids = jax.random.randint(jax.random.PRNGKey(1), (T, B), 1, V)
    t_idx = jnp.arange(T)[:, None]
    ids = jnp.where(t_idx < input_lengths[None, :], ids, 0).astype(jnp.int32)  # pad = 0

    outputs, hidden = encoder_rnn_forward(ids, input_lengths, params)
    jax.block_until_ready((outputs, hidden))

    ref_out, ref_hid = reference_forward(ids, input_lengths, params)
    assert outputs.shape == (T, B, H) and hidden.shape == (2, B, H)
    assert np.allclose(np.asarray(outputs), np.asarray(ref_out), atol=2e-3, rtol=2e-3)
    assert np.allclose(np.asarray(hidden), np.asarray(ref_hid), atol=2e-3, rtol=2e-3)

    print("KERNEL_OK")
</pallas_src>

<mosaic_0001>
module attributes {stable_mosaic.version = 11 : i64} {
  func.func @encoder_gru_kernel(%arg0: memref<32x1xi32, #tpu.memory_space<vmem>>, %arg1: memref<4x1xi32, #tpu.memory_space<vmem>>, %arg2: memref<20x32xf32, #tpu.memory_space<vmem>>, %arg3: memref<32x192xf32, #tpu.memory_space<vmem>>, %arg4: memref<1x192xf32, #tpu.memory_space<vmem>>, %arg5: memref<32x96xf32, #tpu.memory_space<vmem>>, %arg6: memref<1x96xf32, #tpu.memory_space<vmem>>, %arg7: memref<32x96xf32, #tpu.memory_space<vmem>>, %arg8: memref<1x96xf32, #tpu.memory_space<vmem>>, %arg9: memref<8x4x32xf32, #tpu.memory_space<vmem>>, %arg10: memref<8x4x32xf32, #tpu.memory_space<vmem>>, %arg11: memref<2x4x32xf32, #tpu.memory_space<vmem>>) attributes {dimension_semantics = [], scalar_prefetch = 0 : i64, scratch_operands = 0 : i64, tpu.core_type = #tpu.core_type<tc>} {
    %0 = tpu.iota {dimensions = array<i32: 1>} : vector<32x20xi32>
    %c0 = arith.constant 0 : index
    %c0_0 = arith.constant 0 : index
    %1 = vector.load %arg0[%c0, %c0_0] : memref<32x1xi32, #tpu.memory_space<vmem>>, vector<32x1xi32>
    %2 = vector.broadcast %1 : vector<32x1xi32> to vector<32x20xi32>
    %3 = arith.cmpi eq, %0, %2 : vector<32x20xi32>
    %4 = arith.extui %3 : vector<32x20xi1> to vector<32x20xi32>
    %5 = arith.sitofp %4 : vector<32x20xi32> to vector<32x20xf32>
    %c0_1 = arith.constant 0 : index
    %c0_2 = arith.constant 0 : index
    %6 = vector.load %arg2[%c0_1, %c0_2] : memref<20x32xf32, #tpu.memory_space<vmem>>, vector<20x32xf32>
    %cst = arith.constant dense<0.000000e+00> : vector<32x32xf32>
    %7 = tpu.matmul %5, %6, %cst {dimension_numbers = #tpu.dot_dimension_numbers<[1], [0], [0], [1], [0, 0, 1, 1], [], []>} : vector<32x20xf32>, vector<20x32xf32>, vector<32x32xf32> -> vector<32x32xf32>
    %c0_3 = arith.constant 0 : index
    %c0_4 = arith.constant 0 : index
    %8 = vector.load %arg3[%c0_3, %c0_4] : memref<32x192xf32, #tpu.memory_space<vmem>>, vector<32x192xf32>
    %cst_5 = arith.constant dense<0.000000e+00> : vector<32x192xf32>
    %9 = tpu.matmul %7, %8, %cst_5 {dimension_numbers = #tpu.dot_dimension_numbers<[1], [0], [0], [1], [0, 0, 1, 1], [], []>} : vector<32x32xf32>, vector<32x192xf32>, vector<32x192xf32> -> vector<32x192xf32>
    %c0_6 = arith.constant 0 : index
    %c0_7 = arith.constant 0 : index
    %10 = vector.load %arg4[%c0_6, %c0_7] : memref<1x192xf32, #tpu.memory_space<vmem>>, vector<1x192xf32>
    %11 = vector.broadcast %10 : vector<1x192xf32> to vector<32x192xf32>
    %12 = arith.addf %9, %11 : vector<32x192xf32>
    %13 = tpu.iota {dimensions = array<i32: 1>} : vector<4x8xi32>
    %c0_8 = arith.constant 0 : index
    %c0_9 = arith.constant 0 : index
    %14 = vector.load %arg1[%c0_8, %c0_9] : memref<4x1xi32, #tpu.memory_space<vmem>>, vector<4x1xi32>
    %15 = vector.broadcast %14 : vector<4x1xi32> to vector<4x8xi32>
    %16 = arith.cmpi slt, %13, %15 : vector<4x8xi32>
    %17 = arith.extui %16 : vector<4x8xi1> to vector<4x8xi32>
    %18 = arith.sitofp %17 : vector<4x8xi32> to vector<4x8xf32>
    %c0_10 = arith.constant 0 : index
    %c0_11 = arith.constant 0 : index
    %19 = vector.load %arg5[%c0_10, %c0_11] : memref<32x96xf32, #tpu.memory_space<vmem>>, vector<32x96xf32>
    %c0_12 = arith.constant 0 : index
    %c0_13 = arith.constant 0 : index
    %20 = vector.load %arg7[%c0_12, %c0_13] : memref<32x96xf32, #tpu.memory_space<vmem>>, vector<32x96xf32>
    %c0_14 = arith.constant 0 : index
    %c0_15 = arith.constant 0 : index
    %21 = vector.load %arg6[%c0_14, %c0_15] : memref<1x96xf32, #tpu.memory_space<vmem>>, vector<1x96xf32>
    %c0_16 = arith.constant 0 : index
    %c0_17 = arith.constant 0 : index
    %22 = vector.load %arg8[%c0_16, %c0_17] : memref<1x96xf32, #tpu.memory_space<vmem>>, vector<1x96xf32>
    %cst_18 = arith.constant 0.000000e+00 : f32
    %23 = vector.broadcast %cst_18 : f32 to vector<4x32xf32>
    %cst_19 = arith.constant 0.000000e+00 : f32
    %24 = vector.broadcast %cst_19 : f32 to vector<4x32xf32>
    %25 = vector.extract_strided_slice %12 {offsets = [0, 0], sizes = [4, 96], strides = [1, 1]} : vector<32x192xf32> to vector<4x96xf32>
    %26 = vector.extract_strided_slice %12 {offsets = [28, 96], sizes = [4, 96], strides = [1, 1]} : vector<32x192xf32> to vector<4x96xf32>
    %cst_20 = arith.constant dense<0.000000e+00> : vector<4x96xf32>
    %27 = tpu.matmul %23, %19, %cst_20 {dimension_numbers = #tpu.dot_dimension_numbers<[1], [0], [0], [1], [0, 0, 1, 1], [], []>} : vector<4x32xf32>, vector<32x96xf32>, vector<4x96xf32> -> vector<4x96xf32>
    %28 = vector.broadcast %21 : vector<1x96xf32> to vector<4x96xf32>
    %29 = arith.addf %27, %28 : vector<4x96xf32>
    %30 = vector.extract_strided_slice %25 {offsets = [0, 0], sizes = [4, 32], strides = [1, 1]} : vector<4x96xf32> to vector<4x32xf32>
    %31 = vector.extract_strided_slice %29 {offsets = [0, 0], sizes = [4, 32], strides = [1, 1]} : vector<4x96xf32> to vector<4x32xf32>
    %32 = arith.addf %30, %31 : vector<4x32xf32>
    %33 = arith.negf %32 : vector<4x32xf32>
    %34 = math.exp %33 : vector<4x32xf32>
    %cst_21 = arith.constant 1.000000e+00 : f32
    %35 = vector.broadcast %cst_21 : f32 to vector<4x32xf32>
    %36 = arith.addf %35, %34 : vector<4x32xf32>
    %37 = arith.divf %35, %36 : vector<4x32xf32>
    %38 = vector.extract_strided_slice %25 {offsets = [0, 32], sizes = [4, 32], strides = [1, 1]} : vector<4x96xf32> to vector<4x32xf32>
    %39 = vector.extract_strided_slice %29 {offsets = [0, 32], sizes = [4, 32], strides = [1, 1]} : vector<4x96xf32> to vector<4x32xf32>
    %40 = arith.addf %38, %39 : vector<4x32xf32>
    %41 = arith.negf %40 : vector<4x32xf32>
    %42 = math.exp %41 : vector<4x32xf32>
    %cst_22 = arith.constant 1.000000e+00 : f32
    %43 = vector.broadcast %cst_22 : f32 to vector<4x32xf32>
    %44 = arith.addf %43, %42 : vector<4x32xf32>
    %45 = arith.divf %43, %44 : vector<4x32xf32>
    %46 = vector.extract_strided_slice %25 {offsets = [0, 64], sizes = [4, 32], strides = [1, 1]} : vector<4x96xf32> to vector<4x32xf32>
    %47 = vector.extract_strided_slice %29 {offsets = [0, 64], sizes = [4, 32], strides = [1, 1]} : vector<4x96xf32> to vector<4x32xf32>
    %48 = arith.mulf %37, %47 : vector<4x32xf32>
    %49 = arith.addf %46, %48 : vector<4x32xf32>
    %50 = math.tanh %49 : vector<4x32xf32>
    %cst_23 = arith.constant 1.000000e+00 : f32
    %51 = vector.broadcast %cst_23 : f32 to vector<4x32xf32>
    %52 = arith.subf %51, %45 : vector<4x32xf32>
    %53 = arith.mulf %52, %50 : vector<4x32xf32>
    %54 = arith.mulf %45, %23 : vector<4x32xf32>
    %55 = arith.addf %53, %54 : vector<4x32xf32>
    %cst_24 = arith.constant dense<0.000000e+00> : vector<4x96xf32>
    %56 = tpu.matmul %24, %20, %cst_24 {dimension_numbers = #tpu.dot_dimension_numbers<[1], [0], [0], [1], [0, 0, 1, 1], [], []>} : vector<4x32xf32>, vector<32x96xf32>, vector<4x96xf32> -> vector<4x96xf32>
    %57 = vector.broadcast %22 : vector<1x96xf32> to vector<4x96xf32>
    %58 = arith.addf %56, %57 : vector<4x96xf32>
    %59 = vector.extract_strided_slice %26 {offsets = [0, 0], sizes = [4, 32], strides = [1, 1]} : vector<4x96xf32> to vector<4x32xf32>
    %60 = vector.extract_strided_slice %58 {offsets = [0, 0], sizes = [4, 32], strides = [1, 1]} : vector<4x96xf32> to vector<4x32xf32>
    %61 = arith.addf %59, %60 : vector<4x32xf32>
    %62 = arith.negf %61 : vector<4x32xf32>
    %63 = math.exp %62 : vector<4x32xf32>
    %cst_25 = arith.constant 1.000000e+00 : f32
    %64 = vector.broadcast %cst_25 : f32 to vector<4x32xf32>
    %65 = arith.addf %64, %63 : vector<4x32xf32>
    %66 = arith.divf %64, %65 : vector<4x32xf32>
    %67 = vector.extract_strided_slice %26 {offsets = [0, 32], sizes = [4, 32], strides = [1, 1]} : vector<4x96xf32> to vector<4x32xf32>
    %68 = vector.extract_strided_slice %58 {offsets = [0, 32], sizes = [4, 32], strides = [1, 1]} : vector<4x96xf32> to vector<4x32xf32>
    %69 = arith.addf %67, %68 : vector<4x32xf32>
    %70 = arith.negf %69 : vector<4x32xf32>
    %71 = math.exp %70 : vector<4x32xf32>
    %cst_26 = arith.constant 1.000000e+00 : f32
    %72 = vector.broadcast %cst_26 : f32 to vector<4x32xf32>
    %73 = arith.addf %72, %71 : vector<4x32xf32>
    %74 = arith.divf %72, %73 : vector<4x32xf32>
    %75 = vector.extract_strided_slice %26 {offsets = [0, 64], sizes = [4, 32], strides = [1, 1]} : vector<4x96xf32> to vector<4x32xf32>
    %76 = vector.extract_strided_slice %58 {offsets = [0, 64], sizes = [4, 32], strides = [1, 1]} : vector<4x96xf32> to vector<4x32xf32>
    %77 = arith.mulf %66, %76 : vector<4x32xf32>
    %78 = arith.addf %75, %77 : vector<4x32xf32>
    %79 = math.tanh %78 : vector<4x32xf32>
    %cst_27 = arith.constant 1.000000e+00 : f32
    %80 = vector.broadcast %cst_27 : f32 to vector<4x32xf32>
    %81 = arith.subf %80, %74 : vector<4x32xf32>
    %82 = arith.mulf %81, %79 : vector<4x32xf32>
    %83 = arith.mulf %74, %24 : vector<4x32xf32>
    %84 = arith.addf %82, %83 : vector<4x32xf32>
    %85 = vector.extract_strided_slice %18 {offsets = [0, 0], sizes = [4, 1], strides = [1, 1]} : vector<4x8xf32> to vector<4x1xf32>
    %86 = vector.extract_strided_slice %18 {offsets = [0, 7], sizes = [4, 1], strides = [1, 1]} : vector<4x8xf32> to vector<4x1xf32>
    %87 = vector.broadcast %85 : vector<4x1xf32> to vector<4x32xf32>
    %88 = arith.mulf %87, %55 : vector<4x32xf32>
    %c0_28 = arith.constant 0 : index
    %c0_29 = arith.constant 0 : index
    %c0_30 = arith.constant 0 : index
    %89 = vector.load %arg9[%c0_28, %c0_29, %c0_30] : memref<8x4x32xf32, #tpu.memory_space<vmem>>, vector<1x4x32xf32>
    %90 = vector.shape_cast %89 : vector<1x4x32xf32> to vector<4x32xf32>
    %91 = vector.shape_cast %88 : vector<4x32xf32> to vector<1x4x32xf32>
    tpu.vector_store %arg9[%c0_28, %c0_29, %c0_30], %91 {strides = array<i32>} : memref<8x4x32xf32, #tpu.memory_space<vmem>>, vector<1x4x32xf32>,
    %92 = vector.broadcast %86 : vector<4x1xf32> to vector<4x32xf32>
    %93 = arith.mulf %92, %84 : vector<4x32xf32>
    %c7 = arith.constant 7 : index
    %c0_31 = arith.constant 0 : index
    %c0_32 = arith.constant 0 : index
    %94 = vector.load %arg10[%c7, %c0_31, %c0_32] : memref<8x4x32xf32, #tpu.memory_space<vmem>>, vector<1x4x32xf32>
    %95 = vector.shape_cast %94 : vector<1x4x32xf32> to vector<4x32xf32>
    %96 = vector.shape_cast %93 : vector<4x32xf32> to vector<1x4x32xf32>
    tpu.vector_store %arg10[%c7, %c0_31, %c0_32], %96 {strides = array<i32>} : memref<8x4x32xf32, #tpu.memory_space<vmem>>, vector<1x4x32xf32>,
    %97 = arith.subf %55, %23 : vector<4x32xf32>
    %98 = vector.broadcast %85 : vector<4x1xf32> to vector<4x32xf32>
    %99 = arith.mulf %98, %97 : vector<4x32xf32>
    %100 = arith.addf %23, %99 : vector<4x32xf32>
    %101 = arith.subf %84, %24 : vector<4x32xf32>
    %102 = vector.broadcast %86 : vector<4x1xf32> to vector<4x32xf32>
    %103 = arith.mulf %102, %101 : vector<4x32xf32>
    %104 = arith.addf %24, %103 : vector<4x32xf32>
    %105 = vector.extract_strided_slice %12 {offsets = [4, 0], sizes = [4, 96], strides = [1, 1]} : vector<32x192xf32> to vector<4x96xf32>
    %106 = vector.extract_strided_slice %12 {offsets = [24, 96], sizes = [4, 96], strides = [1, 1]} : vector<32x192xf32> to vector<4x96xf32>
    %cst_33 = arith.constant dense<0.000000e+00> : vector<4x96xf32>
    %107 = tpu.matmul %100, %19, %cst_33 {dimension_numbers = #tpu.dot_dimension_numbers<[1], [0], [0], [1], [0, 0, 1, 1], [], []>} : vector<4x32xf32>, vector<32x96xf32>, vector<4x96xf32> -> vector<4x96xf32>
    %108 = vector.broadcast %21 : vector<1x96xf32> to vector<4x96xf32>
    %109 = arith.addf %107, %108 : vector<4x96xf32>
    %110 = vector.extract_strided_slice %105 {offsets = [0, 0], sizes = [4, 32], strides = [1, 1]} : vector<4x96xf32> to vector<4x32xf32>
    %111 = vector.extract_strided_slice %109 {offsets = [0, 0], sizes = [4, 32], strides = [1, 1]} : vector<4x96xf32> to vector<4x32xf32>
    %112 = arith.addf %110, %111 : vector<4x32xf32>
    %113 = arith.negf %112 : vector<4x32xf32>
    %114 = math.exp %113 : vector<4x32xf32>
    %cst_34 = arith.constant 1.000000e+00 : f32
    %115 = vector.broadcast %cst_34 : f32 to vector<4x32xf32>
    %116 = arith.addf %115, %114 : vector<4x32xf32>
    %117 = arith.divf %115, %116 : vector<4x32xf32>
    %118 = vector.extract_strided_slice %105 {offsets = [0, 32], sizes = [4, 32], strides = [1, 1]} : vector<4x96xf32> to vector<4x32xf32>
    %119 = vector.extract_strided_slice %109 {offsets = [0, 32], sizes = [4, 32], strides = [1, 1]} : vector<4x96xf32> to vector<4x32xf32>
    %120 = arith.addf %118, %119 : vector<4x32xf32>
    %121 = arith.negf %120 : vector<4x32xf32>
    %122 = math.exp %121 : vector<4x32xf32>
    %cst_35 = arith.constant 1.000000e+00 : f32
    %123 = vector.broadcast %cst_35 : f32 to vector<4x32xf32>
    %124 = arith.addf %123, %122 : vector<4x32xf32>
    %125 = arith.divf %123, %124 : vector<4x32xf32>
    %126 = vector.extract_strided_slice %105 {offsets = [0, 64], sizes = [4, 32], strides = [1, 1]} : vector<4x96xf32> to vector<4x32xf32>
    %127 = vector.extract_strided_slice %109 {offsets = [0, 64], sizes = [4, 32], strides = [1, 1]} : vector<4x96xf32> to vector<4x32xf32>
    %128 = arith.mulf %117, %127 : vector<4x32xf32>
    %129 = arith.addf %126, %128 : vector<4x32xf32>
    %130 = math.tanh %129 : vector<4x32xf32>
    %cst_36 = arith.constant 1.000000e+00 : f32
    %131 = vector.broadcast %cst_36 : f32 to vector<4x32xf32>
    %132 = arith.subf %131, %125 : vector<4x32xf32>
    %133 = arith.mulf %132, %130 : vector<4x32xf32>
    %134 = arith.mulf %125, %100 : vector<4x32xf32>
    %135 = arith.addf %133, %134 : vector<4x32xf32>
    %cst_37 = arith.constant dense<0.000000e+00> : vector<4x96xf32>
    %136 = tpu.matmul %104, %20, %cst_37 {dimension_numbers = #tpu.dot_dimension_numbers<[1], [0], [0], [1], [0, 0, 1, 1], [], []>} : vector<4x32xf32>, vector<32x96xf32>, vector<4x96xf32> -> vector<4x96xf32>
    %137 = vector.broadcast %22 : vector<1x96xf32> to vector<4x96xf32>
    %138 = arith.addf %136, %137 : vector<4x96xf32>
    %139 = vector.extract_strided_slice %106 {offsets = [0, 0], sizes = [4, 32], strides = [1, 1]} : vector<4x96xf32> to vector<4x32xf32>
    %140 = vector.extract_strided_slice %138 {offsets = [0, 0], sizes = [4, 32], strides = [1, 1]} : vector<4x96xf32> to vector<4x32xf32>
    %141 = arith.addf %139, %140 : vector<4x32xf32>
    %142 = arith.negf %141 : vector<4x32xf32>
    %143 = math.exp %142 : vector<4x32xf32>
    %cst_38 = arith.constant 1.000000e+00 : f32
    %144 = vector.broadcast %cst_38 : f32 to vector<4x32xf32>
    %145 = arith.addf %144, %143 : vector<4x32xf32>
    %146 = arith.divf %144, %145 : vector<4x32xf32>
    %147 = vector.extract_strided_slice %106 {offsets = [0, 32], sizes = [4, 32], strides = [1, 1]} : vector<4x96xf32> to vector<4x32xf32>
    %148 = vector.extract_strided_slice %138 {offsets = [0, 32], sizes = [4, 32], strides = [1, 1]} : vector<4x96xf32> to vector<4x32xf32>
    %149 = arith.addf %147, %148 : vector<4x32xf32>
    %150 = arith.negf %149 : vector<4x32xf32>
    %151 = math.exp %150 : vector<4x32xf32>
    %cst_39 = arith.constant 1.000000e+00 : f32
    %152 = vector.broadcast %cst_39 : f32 to vector<4x32xf32>
    %153 = arith.addf %152, %151 : vector<4x32xf32>
    %154 = arith.divf %152, %153 : vector<4x32xf32>
    %155 = vector.extract_strided_slice %106 {offsets = [0, 64], sizes = [4, 32], strides = [1, 1]} : vector<4x96xf32> to vector<4x32xf32>
    %156 = vector.extract_strided_slice %138 {offsets = [0, 64], sizes = [4, 32], strides = [1, 1]} : vector<4x96xf32> to vector<4x32xf32>
    %157 = arith.mulf %146, %156 : vector<4x32xf32>
    %158 = arith.addf %155, %157 : vector<4x32xf32>
    %159 = math.tanh %158 : vector<4x32xf32>
    %cst_40 = arith.constant 1.000000e+00 : f32
    %160 = vector.broadcast %cst_40 : f32 to vector<4x32xf32>
    %161 = arith.subf %160, %154 : vector<4x32xf32>
    %162 = arith.mulf %161, %159 : vector<4x32xf32>
    %163 = arith.mulf %154, %104 : vector<4x32xf32>
    %164 = arith.addf %162, %163 : vector<4x32xf32>
    %165 = vector.extract_strided_slice %18 {offsets = [0, 1], sizes = [4, 1], strides = [1, 1]} : vector<4x8xf32> to vector<4x1xf32>
    %166 = vector.extract_strided_slice %18 {offsets = [0, 6], sizes = [4, 1], strides = [1, 1]} : vector<4x8xf32> to vector<4x1xf32>
    %167 = vector.broadcast %165 : vector<4x1xf32> to vector<4x32xf32>
    %168 = arith.mulf %167, %135 : vector<4x32xf32>
    %c1 = arith.constant 1 : index
    %c0_41 = arith.constant 0 : index
    %c0_42 = arith.constant 0 : index
    %169 = vector.load %arg9[%c1, %c0_41, %c0_42] : memref<8x4x32xf32, #tpu.memory_space<vmem>>, vector<1x4x32xf32>
    %170 = vector.shape_cast %169 : vector<1x4x32xf32> to vector<4x32xf32>
    %171 = vector.shape_cast %168 : vector<4x32xf32> to vector<1x4x32xf32>
    tpu.vector_store %arg9[%c1, %c0_41, %c0_42], %171 {strides = array<i32>} : memref<8x4x32xf32, #tpu.memory_space<vmem>>, vector<1x4x32xf32>,
    %172 = vector.broadcast %166 : vector<4x1xf32> to vector<4x32xf32>
    %173 = arith.mulf %172, %164 : vector<4x32xf32>
    %c6 = arith.constant 6 : index
    %c0_43 = arith.constant 0 : index
    %c0_44 = arith.constant 0 : index
    %174 = vector.load %arg10[%c6, %c0_43, %c0_44] : memref<8x4x32xf32, #tpu.memory_space<vmem>>, vector<1x4x32xf32>
    %175 = vector.shape_cast %174 : vector<1x4x32xf32> to vector<4x32xf32>
    %176 = vector.shape_cast %173 : vector<4x32xf32> to vector<1x4x32xf32>
    tpu.vector_store %arg10[%c6, %c0_43, %c0_44], %176 {strides = array<i32>} : memref<8x4x32xf32, #tpu.memory_space<vmem>>, vector<1x4x32xf32>,
    %177 = arith.subf %135, %100 : vector<4x32xf32>
    %178 = vector.broadcast %165 : vector<4x1xf32> to vector<4x32xf32>
    %179 = arith.mulf %178, %177 : vector<4x32xf32>
    %180 = arith.addf %100, %179 : vector<4x32xf32>
    %181 = arith.subf %164, %104 : vector<4x32xf32>
    %182 = vector.broadcast %166 : vector<4x1xf32> to vector<4x32xf32>
    %183 = arith.mulf %182, %181 : vector<4x32xf32>
    %184 = arith.addf %104, %183 : vector<4x32xf32>
    %185 = vector.extract_strided_slice %12 {offsets = [8, 0], sizes = [4, 96], strides = [1, 1]} : vector<32x192xf32> to vector<4x96xf32>
    %186 = vector.extract_strided_slice %12 {offsets = [20, 96], sizes = [4, 96], strides = [1, 1]} : vector<32x192xf32> to vector<4x96xf32>
    %cst_45 = arith.constant dense<0.000000e+00> : vector<4x96xf32>
    %187 = tpu.matmul %180, %19, %cst_45 {dimension_numbers = #tpu.dot_dimension_numbers<[1], [0], [0], [1], [0, 0, 1, 1], [], []>} : vector<4x32xf32>, vector<32x96xf32>, vector<4x96xf32> -> vector<4x96xf32>
    %188 = vector.broadcast %21 : vector<1x96xf32> to vector<4x96xf32>
    %189 = arith.addf %187, %188 : vector<4x96xf32>
    %190 = vector.extract_strided_slice %185 {offsets = [0, 0], sizes = [4, 32], strides = [1, 1]} : vector<4x96xf32> to vector<4x32xf32>
    %191 = vector.extract_strided_slice %189 {offsets = [0, 0], sizes = [4, 32], strides = [1, 1]} : vector<4x96xf32> to vector<4x32xf32>
    %192 = arith.addf %190, %191 : vector<4x32xf32>
    %193 = arith.negf %192 : vector<4x32xf32>
    %194 = math.exp %193 : vector<4x32xf32>
    %cst_46 = arith.constant 1.000000e+00 : f32
    %195 = vector.broadcast %cst_46 : f32 to vector<4x32xf32>
    %196 = arith.addf %195, %194 : vector<4x32xf32>
    %197 = arith.divf %195, %196 : vector<4x32xf32>
    %198 = vector.extract_strided_slice %185 {offsets = [0, 32], sizes = [4, 32], strides = [1, 1]} : vector<4x96xf32> to vector<4x32xf32>
    %199 = vector.extract_strided_slice %189 {offsets = [0, 32], sizes = [4, 32], strides = [1, 1]} : vector<4x96xf32> to vector<4x32xf32>
    %200 = arith.addf %198, %199 : vector<4x32xf32>
    %201 = arith.negf %200 : vector<4x32xf32>
    %202 = math.exp %201 : vector<4x32xf32>
    %cst_47 = arith.constant 1.000000e+00 : f32
    %203 = vector.broadcast %cst_47 : f32 to vector<4x32xf32>
    %204 = arith.addf %203, %202 : vector<4x32xf32>
    %205 = arith.divf %203, %204 : vector<4x32xf32>
    %206 = vector.extract_strided_slice %185 {offsets = [0, 64], sizes = [4, 32], strides = [1, 1]} : vector<4x96xf32> to vector<4x32xf32>
    %207 = vector.extract_strided_slice %189 {offsets = [0, 64], sizes = [4, 32], strides = [1, 1]} : vector<4x96xf32> to vector<4x32xf32>
    %208 = arith.mulf %197, %207 : vector<4x32xf32>
    %209 = arith.addf %206, %208 : vector<4x32xf32>
    %210 = math.tanh %209 : vector<4x32xf32>
    %cst_48 = arith.constant 1.000000e+00 : f32
    %211 = vector.broadcast %cst_48 : f32 to vector<4x32xf32>
    %212 = arith.subf %211, %205 : vector<4x32xf32>
    %213 = arith.mulf %212, %210 : vector<4x32xf32>
    %214 = arith.mulf %205, %180 : vector<4x32xf32>
    %215 = arith.addf %213, %214 : vector<4x32xf32>
    %cst_49 = arith.constant dense<0.000000e+00> : vector<4x96xf32>
    %216 = tpu.matmul %184, %20, %cst_49 {dimension_numbers = #tpu.dot_dimension_numbers<[1], [0], [0], [1], [0, 0, 1, 1], [], []>} : vector<4x32xf32>, vector<32x96xf32>, vector<4x96xf32> -> vector<4x96xf32>
    %217 = vector.broadcast %22 : vector<1x96xf32> to vector<4x96xf32>
    %218 = arith.addf %216, %217 : vector<4x96xf32>
    %219 = vector.extract_strided_slice %186 {offsets = [0, 0], sizes = [4, 32], strides = [1, 1]} : vector<4x96xf32> to vector<4x32xf32>
    %220 = vector.extract_strided_slice %218 {offsets = [0, 0], sizes = [4, 32], strides = [1, 1]} : vector<4x96xf32> to vector<4x32xf32>
    %221 = arith.addf %219, %220 : vector<4x32xf32>
    %222 = arith.negf %221 : vector<4x32xf32>
    %223 = math.exp %222 : vector<4x32xf32>
    %cst_50 = arith.constant 1.000000e+00 : f32
    %224 = vector.broadcast %cst_50 : f32 to vector<4x32xf32>
    %225 = arith.addf %224, %223 : vector<4x32xf32>
    %226 = arith.divf %224, %225 : vector<4x32xf32>
    %227 = vector.extract_strided_slice %186 {offsets = [0, 32], sizes = [4, 32], strides = [1, 1]} : vector<4x96xf32> to vector<4x32xf32>
    %228 = vector.extract_strided_slice %218 {offsets = [0, 32], sizes = [4, 32], strides = [1, 1]} : vector<4x96xf32> to vector<4x32xf32>
    %229 = arith.addf %227, %228 : vector<4x32xf32>
    %230 = arith.negf %229 : vector<4x32xf32>
    %231 = math.exp %230 : vector<4x32xf32>
    %cst_51 = arith.constant 1.000000e+00 : f32
    %232 = vector.broadcast %cst_51 : f32 to vector<4x32xf32>
    %233 = arith.addf %232, %231 : vector<4x32xf32>
    %234 = arith.divf %232, %233 : vector<4x32xf32>
    %235 = vector.extract_strided_slice %186 {offsets = [0, 64], sizes = [4, 32], strides = [1, 1]} : vector<4x96xf32> to vector<4x32xf32>
    %236 = vector.extract_strided_slice %218 {offsets = [0, 64], sizes = [4, 32], strides = [1, 1]} : vector<4x96xf32> to vector<4x32xf32>
    %237 = arith.mulf %226, %236 : vector<4x32xf32>
    %238 = arith.addf %235, %237 : vector<4x32xf32>
    %239 = math.tanh %238 : vector<4x32xf32>
    %cst_52 = arith.constant 1.000000e+00 : f32
    %240 = vector.broadcast %cst_52 : f32 to vector<4x32xf32>
    %241 = arith.subf %240, %234 : vector<4x32xf32>
    %242 = arith.mulf %241, %239 : vector<4x32xf32>
    %243 = arith.mulf %234, %184 : vector<4x32xf32>
    %244 = arith.addf %242, %243 : vector<4x32xf32>
    %245 = vector.extract_strided_slice %18 {offsets = [0, 2], sizes = [4, 1], strides = [1, 1]} : vector<4x8xf32> to vector<4x1xf32>
    %246 = vector.extract_strided_slice %18 {offsets = [0, 5], sizes = [4, 1], strides = [1, 1]} : vector<4x8xf32> to vector<4x1xf32>
    %247 = vector.broadcast %245 : vector<4x1xf32> to vector<4x32xf32>
    %248 = arith.mulf %247, %215 : vector<4x32xf32>
    %c2 = arith.constant 2 : index
    %c0_53 = arith.constant 0 : index
    %c0_54 = arith.constant 0 : index
    %249 = vector.load %arg9[%c2, %c0_53, %c0_54] : memref<8x4x32xf32, #tpu.memory_space<vmem>>, vector<1x4x32xf32>
    %250 = vector.shape_cast %249 : vector<1x4x32xf32> to vector<4x32xf32>
    %251 = vector.shape_cast %248 : vector<4x32xf32> to vector<1x4x32xf32>
    tpu.vector_store %arg9[%c2, %c0_53, %c0_54], %251 {strides = array<i32>} : memref<8x4x32xf32, #tpu.memory_space<vmem>>, vector<1x4x32xf32>,
    %252 = vector.broadcast %246 : vector<4x1xf32> to vector<4x32xf32>
    %253 = arith.mulf %252, %244 : vector<4x32xf32>
    %c5 = arith.constant 5 : index
    %c0_55 = arith.constant 0 : index
    %c0_56 = arith.constant 0 : index
    %254 = vector.load %arg10[%c5, %c0_55, %c0_56] : memref<8x4x32xf32, #tpu.memory_space<vmem>>, vector<1x4x32xf32>
    %255 = vector.shape_cast %254 : vector<1x4x32xf32> to vector<4x32xf32>
    %256 = vector.shape_cast %253 : vector<4x32xf32> to vector<1x4x32xf32>
    tpu.vector_store %arg10[%c5, %c0_55, %c0_56], %256 {strides = array<i32>} : memref<8x4x32xf32, #tpu.memory_space<vmem>>, vector<1x4x32xf32>,
    %257 = arith.subf %215, %180 : vector<4x32xf32>
    %258 = vector.broadcast %245 : vector<4x1xf32> to vector<4x32xf32>
    %259 = arith.mulf %258, %257 : vector<4x32xf32>
    %260 = arith.addf %180, %259 : vector<4x32xf32>
    %261 = arith.subf %244, %184 : vector<4x32xf32>
    %262 = vector.broadcast %246 : vector<4x1xf32> to vector<4x32xf32>
    %263 = arith.mulf %262, %261 : vector<4x32xf32>
    %264 = arith.addf %184, %263 : vector<4x32xf32>
    %265 = vector.extract_strided_slice %12 {offsets = [12, 0], sizes = [4, 96], strides = [1, 1]} : vector<32x192xf32> to vector<4x96xf32>
    %266 = vector.extract_strided_slice %12 {offsets = [16, 96], sizes = [4, 96], strides = [1, 1]} : vector<32x192xf32> to vector<4x96xf32>
    %cst_57 = arith.constant dense<0.000000e+00> : vector<4x96xf32>
    %267 = tpu.matmul %260, %19, %cst_57 {dimension_numbers = #tpu.dot_dimension_numbers<[1], [0], [0], [1], [0, 0, 1, 1], [], []>} : vector<4x32xf32>, vector<32x96xf32>, vector<4x96xf32> -> vector<4x96xf32>
    %268 = vector.broadcast %21 : vector<1x96xf32> to vector<4x96xf32>
    %269 = arith.addf %267, %268 : vector<4x96xf32>
    %270 = vector.extract_strided_slice %265 {offsets = [0, 0], sizes = [4, 32], strides = [1, 1]} : vector<4x96xf32> to vector<4x32xf32>
    %271 = vector.extract_strided_slice %269 {offsets = [0, 0], sizes = [4, 32], strides = [1, 1]} : vector<4x96xf32> to vector<4x32xf32>
    %272 = arith.addf %270, %271 : vector<4x32xf32>
    %273 = arith.negf %272 : vector<4x32xf32>
    %274 = math.exp %273 : vector<4x32xf32>
    %cst_58 = arith.constant 1.000000e+00 : f32
    %275 = vector.broadcast %cst_58 : f32 to vector<4x32xf32>
    %276 = arith.addf %275, %274 : vector<4x32xf32>
    %277 = arith.divf %275, %276 : vector<4x32xf32>
    %278 = vector.extract_strided_slice %265 {offsets = [0, 32], sizes = [4, 32], strides = [1, 1]} : vector<4x96xf32> to vector<4x32xf32>
    %279 = vector.extract_strided_slice %269 {offsets = [0, 32], sizes = [4, 32], strides = [1, 1]} : vector<4x96xf32> to vector<4x32xf32>
    %280 = arith.addf %278, %279 : vector<4x32xf32>
    %281 = arith.negf %280 : vector<4x32xf32>
    %282 = math.exp %281 : vector<4x32xf32>
    %cst_59 = arith.constant 1.000000e+00 : f32
    %283 = vector.broadcast %cst_59 : f32 to vector<4x32xf32>
    %284 = arith.addf %283, %282 : vector<4x32xf32>
    %285 = arith.divf %283, %284 : vector<4x32xf32>
    %286 = vector.extract_strided_slice %265 {offsets = [0, 64], sizes = [4, 32], strides = [1, 1]} : vector<4x96xf32> to vector<4x32xf32>
    %287 = vector.extract_strided_slice %269 {offsets = [0, 64], sizes = [4, 32], strides = [1, 1]} : vector<4x96xf32> to vector<4x32xf32>
    %288 = arith.mulf %277, %287 : vector<4x32xf32>
    %289 = arith.addf %286, %288 : vector<4x32xf32>
    %290 = math.tanh %289 : vector<4x32xf32>
    %cst_60 = arith.constant 1.000000e+00 : f32
    %291 = vector.broadcast %cst_60 : f32 to vector<4x32xf32>
    %292 = arith.subf %291, %285 : vector<4x32xf32>
    %293 = arith.mulf %292, %290 : vector<4x32xf32>
    %294 = arith.mulf %285, %260 : vector<4x32xf32>
    %295 = arith.addf %293, %294 : vector<4x32xf32>
    %cst_61 = arith.constant dense<0.000000e+00> : vector<4x96xf32>
    %296 = tpu.matmul %264, %20, %cst_61 {dimension_numbers = #tpu.dot_dimension_numbers<[1], [0], [0], [1], [0, 0, 1, 1], [], []>} : vector<4x32xf32>, vector<32x96xf32>, vector<4x96xf32> -> vector<4x96xf32>
    %297 = vector.broadcast %22 : vector<1x96xf32> to vector<4x96xf32>
    %298 = arith.addf %296, %297 : vector<4x96xf32>
    %299 = vector.extract_strided_slice %266 {offsets = [0, 0], sizes = [4, 32], strides = [1, 1]} : vector<4x96xf32> to vector<4x32xf32>
    %300 = vector.extract_strided_slice %298 {offsets = [0, 0], sizes = [4, 32], strides = [1, 1]} : vector<4x96xf32> to vector<4x32xf32>
    %301 = arith.addf %299, %300 : vector<4x32xf32>
    %302 = arith.negf %301 : vector<4x32xf32>
    %303 = math.exp %302 : vector<4x32xf32>
    %cst_62 = arith.constant 1.000000e+00 : f32
    %304 = vector.broadcast %cst_62 : f32 to vector<4x32xf32>
    %305 = arith.addf %304, %303 : vector<4x32xf32>
    %306 = arith.divf %304, %305 : vector<4x32xf32>
    %307 = vector.extract_strided_slice %266 {offsets = [0, 32], sizes = [4, 32], strides = [1, 1]} : vector<4x96xf32> to vector<4x32xf32>
    %308 = vector.extract_strided_slice %298 {offsets = [0, 32], sizes = [4, 32], strides = [1, 1]} : vector<4x96xf32> to vector<4x32xf32>
    %309 = arith.addf %307, %308 : vector<4x32xf32>
    %310 = arith.negf %309 : vector<4x32xf32>
    %311 = math.exp %310 : vector<4x32xf32>
    %cst_63 = arith.constant 1.000000e+00 : f32
    %312 = vector.broadcast %cst_63 : f32 to vector<4x32xf32>
    %313 = arith.addf %312, %311 : vector<4x32xf32>
    %314 = arith.divf %312, %313 : vector<4x32xf32>
    %315 = vector.extract_strided_slice %266 {offsets = [0, 64], sizes = [4, 32], strides = [1, 1]} : vector<4x96xf32> to vector<4x32xf32>
    %316 = vector.extract_strided_slice %298 {offsets = [0, 64], sizes = [4, 32], strides = [1, 1]} : vector<4x96xf32> to vector<4x32xf32>
    %317 = arith.mulf %306, %316 : vector<4x32xf32>
    %318 = arith.addf %315, %317 : vector<4x32xf32>
    %319 = math.tanh %318 : vector<4x32xf32>
    %cst_64 = arith.constant 1.000000e+00 : f32
    %320 = vector.broadcast %cst_64 : f32 to vector<4x32xf32>
    %321 = arith.subf %320, %314 : vector<4x32xf32>
    %322 = arith.mulf %321, %319 : vector<4x32xf32>
    %323 = arith.mulf %314, %264 : vector<4x32xf32>
    %324 = arith.addf %322, %323 : vector<4x32xf32>
    %325 = vector.extract_strided_slice %18 {offsets = [0, 3], sizes = [4, 1], strides = [1, 1]} : vector<4x8xf32> to vector<4x1xf32>
    %326 = vector.extract_strided_slice %18 {offsets = [0, 4], sizes = [4, 1], strides = [1, 1]} : vector<4x8xf32> to vector<4x1xf32>
    %327 = vector.broadcast %325 : vector<4x1xf32> to vector<4x32xf32>
    %328 = arith.mulf %327, %295 : vector<4x32xf32>
    %c3 = arith.constant 3 : index
    %c0_65 = arith.constant 0 : index
    %c0_66 = arith.constant 0 : index
    %329 = vector.load %arg9[%c3, %c0_65, %c0_66] : memref<8x4x32xf32, #tpu.memory_space<vmem>>, vector<1x4x32xf32>
    %330 = vector.shape_cast %329 : vector<1x4x32xf32> to vector<4x32xf32>
    %331 = vector.shape_cast %328 : vector<4x32xf32> to vector<1x4x32xf32>
    tpu.vector_store %arg9[%c3, %c0_65, %c0_66], %331 {strides = array<i32>} : memref<8x4x32xf32, #tpu.memory_space<vmem>>, vector<1x4x32xf32>,
    %332 = vector.broadcast %326 : vector<4x1xf32> to vector<4x32xf32>
    %333 = arith.mulf %332, %324 : vector<4x32xf32>
    %c4 = arith.constant 4 : index
    %c0_67 = arith.constant 0 : index
    %c0_68 = arith.constant 0 : index
    %334 = vector.load %arg10[%c4, %c0_67, %c0_68] : memref<8x4x32xf32, #tpu.memory_space<vmem>>, vector<1x4x32xf32>
    %335 = vector.shape_cast %334 : vector<1x4x32xf32> to vector<4x32xf32>
    %336 = vector.shape_cast %333 : vector<4x32xf32> to vector<1x4x32xf32>
    tpu.vector_store %arg10[%c4, %c0_67, %c0_68], %336 {strides = array<i32>} : memref<8x4x32xf32, #tpu.memory_space<vmem>>, vector<1x4x32xf32>,
    %337 = arith.subf %295, %260 : vector<4x32xf32>
    %338 = vector.broadcast %325 : vector<4x1xf32> to vector<4x32xf32>
    %339 = arith.mulf %338, %337 : vector<4x32xf32>
    %340 = arith.addf %260, %339 : vector<4x32xf32>
    %341 = arith.subf %324, %264 : vector<4x32xf32>
    %342 = vector.broadcast %326 : vector<4x1xf32> to vector<4x32xf32>
    %343 = arith.mulf %342, %341 : vector<4x32xf32>
    %344 = arith.addf %264, %343 : vector<4x32xf32>
    %345 = vector.extract_strided_slice %12 {offsets = [16, 0], sizes = [4, 96], strides = [1, 1]} : vector<32x192xf32> to vector<4x96xf32>
    %346 = vector.extract_strided_slice %12 {offsets = [12, 96], sizes = [4, 96], strides = [1, 1]} : vector<32x192xf32> to vector<4x96xf32>
    %cst_69 = arith.constant dense<0.000000e+00> : vector<4x96xf32>
    %347 = tpu.matmul %340, %19, %cst_69 {dimension_numbers = #tpu.dot_dimension_numbers<[1], [0], [0], [1], [0, 0, 1, 1], [], []>} : vector<4x32xf32>, vector<32x96xf32>, vector<4x96xf32> -> vector<4x96xf32>
    %348 = vector.broadcast %21 : vector<1x96xf32> to vector<4x96xf32>
    %349 = arith.addf %347, %348 : vector<4x96xf32>
    %350 = vector.extract_strided_slice %345 {offsets = [0, 0], sizes = [4, 32], strides = [1, 1]} : vector<4x96xf32> to vector<4x32xf32>
    %351 = vector.extract_strided_slice %349 {offsets = [0, 0], sizes = [4, 32], strides = [1, 1]} : vector<4x96xf32> to vector<4x32xf32>
    %352 = arith.addf %350, %351 : vector<4x32xf32>
    %353 = arith.negf %352 : vector<4x32xf32>
    %354 = math.exp %353 : vector<4x32xf32>
    %cst_70 = arith.constant 1.000000e+00 : f32
    %355 = vector.broadcast %cst_70 : f32 to vector<4x32xf32>
    %356 = arith.addf %355, %354 : vector<4x32xf32>
    %357 = arith.divf %355, %356 : vector<4x32xf32>
    %358 = vector.extract_strided_slice %345 {offsets = [0, 32], sizes = [4, 32], strides = [1, 1]} : vector<4x96xf32> to vector<4x32xf32>
    %359 = vector.extract_strided_slice %349 {offsets = [0, 32], sizes = [4, 32], strides = [1, 1]} : vector<4x96xf32> to vector<4x32xf32>
    %360 = arith.addf %358, %359 : vector<4x32xf32>
    %361 = arith.negf %360 : vector<4x32xf32>
    %362 = math.exp %361 : vector<4x32xf32>
    %cst_71 = arith.constant 1.000000e+00 : f32
    %363 = vector.broadcast %cst_71 : f32 to vector<4x32xf32>
    %364 = arith.addf %363, %362 : vector<4x32xf32>
    %365 = arith.divf %363, %364 : vector<4x32xf32>
    %366 = vector.extract_strided_slice %345 {offsets = [0, 64], sizes = [4, 32], strides = [1, 1]} : vector<4x96xf32> to vector<4x32xf32>
    %367 = vector.extract_strided_slice %349 {offsets = [0, 64], sizes = [4, 32], strides = [1, 1]} : vector<4x96xf32> to vector<4x32xf32>
    %368 = arith.mulf %357, %367 : vector<4x32xf32>
    %369 = arith.addf %366, %368 : vector<4x32xf32>
    %370 = math.tanh %369 : vector<4x32xf32>
    %cst_72 = arith.constant 1.000000e+00 : f32
    %371 = vector.broadcast %cst_72 : f32 to vector<4x32xf32>
    %372 = arith.subf %371, %365 : vector<4x32xf32>
    %373 = arith.mulf %372, %370 : vector<4x32xf32>
    %374 = arith.mulf %365, %340 : vector<4x32xf32>
    %375 = arith.addf %373, %374 : vector<4x32xf32>
    %cst_73 = arith.constant dense<0.000000e+00> : vector<4x96xf32>
    %376 = tpu.matmul %344, %20, %cst_73 {dimension_numbers = #tpu.dot_dimension_numbers<[1], [0], [0], [1], [0, 0, 1, 1], [], []>} : vector<4x32xf32>, vector<32x96xf32>, vector<4x96xf32> -> vector<4x96xf32>
    %377 = vector.broadcast %22 : vector<1x96xf32> to vector<4x96xf32>
    %378 = arith.addf %376, %377 : vector<4x96xf32>
    %379 = vector.extract_strided_slice %346 {offsets = [0, 0], sizes = [4, 32], strides = [1, 1]} : vector<4x96xf32> to vector<4x32xf32>
    %380 = vector.extract_strided_slice %378 {offsets = [0, 0], sizes = [4, 32], strides = [1, 1]} : vector<4x96xf32> to vector<4x32xf32>
    %381 = arith.addf %379, %380 : vector<4x32xf32>
    %382 = arith.negf %381 : vector<4x32xf32>
    %383 = math.exp %382 : vector<4x32xf32>
    %cst_74 = arith.constant 1.000000e+00 : f32
    %384 = vector.broadcast %cst_74 : f32 to vector<4x32xf32>
    %385 = arith.addf %384, %383 : vector<4x32xf32>
    %386 = arith.divf %384, %385 : vector<4x32xf32>
    %387 = vector.extract_strided_slice %346 {offsets = [0, 32], sizes = [4, 32], strides = [1, 1]} : vector<4x96xf32> to vector<4x32xf32>
    %388 = vector.extract_strided_slice %378 {offsets = [0, 32], sizes = [4, 32], strides = [1, 1]} : vector<4x96xf32> to vector<4x32xf32>
    %389 = arith.addf %387, %388 : vector<4x32xf32>
    %390 = arith.negf %389 : vector<4x32xf32>
    %391 = math.exp %390 : vector<4x32xf32>
    %cst_75 = arith.constant 1.000000e+00 : f32
    %392 = vector.broadcast %cst_75 : f32 to vector<4x32xf32>
    %393 = arith.addf %392, %391 : vector<4x32xf32>
    %394 = arith.divf %392, %393 : vector<4x32xf32>
    %395 = vector.extract_strided_slice %346 {offsets = [0, 64], sizes = [4, 32], strides = [1, 1]} : vector<4x96xf32> to vector<4x32xf32>
    %396 = vector.extract_strided_slice %378 {offsets = [0, 64], sizes = [4, 32], strides = [1, 1]} : vector<4x96xf32> to vector<4x32xf32>
    %397 = arith.mulf %386, %396 : vector<4x32xf32>
    %398 = arith.addf %395, %397 : vector<4x32xf32>
    %399 = math.tanh %398 : vector<4x32xf32>
    %cst_76 = arith.constant 1.000000e+00 : f32
    %400 = vector.broadcast %cst_76 : f32 to vector<4x32xf32>
    %401 = arith.subf %400, %394 : vector<4x32xf32>
    %402 = arith.mulf %401, %399 : vector<4x32xf32>
    %403 = arith.mulf %394, %344 : vector<4x32xf32>
    %404 = arith.addf %402, %403 : vector<4x32xf32>
    %405 = vector.extract_strided_slice %18 {offsets = [0, 4], sizes = [4, 1], strides = [1, 1]} : vector<4x8xf32> to vector<4x1xf32>
    %406 = vector.extract_strided_slice %18 {offsets = [0, 3], sizes = [4, 1], strides = [1, 1]} : vector<4x8xf32> to vector<4x1xf32>
    %407 = vector.broadcast %405 : vector<4x1xf32> to vector<4x32xf32>
    %408 = arith.mulf %407, %375 : vector<4x32xf32>
    %c4_77 = arith.constant 4 : index
    %c0_78 = arith.constant 0 : index
    %c0_79 = arith.constant 0 : index
    %409 = vector.load %arg9[%c4_77, %c0_78, %c0_79] : memref<8x4x32xf32, #tpu.memory_space<vmem>>, vector<1x4x32xf32>
    %410 = vector.shape_cast %409 : vector<1x4x32xf32> to vector<4x32xf32>
    %411 = vector.shape_cast %408 : vector<4x32xf32> to vector<1x4x32xf32>
    tpu.vector_store %arg9[%c4_77, %c0_78, %c0_79], %411 {strides = array<i32>} : memref<8x4x32xf32, #tpu.memory_space<vmem>>, vector<1x4x32xf32>,
    %412 = vector.broadcast %406 : vector<4x1xf32> to vector<4x32xf32>
    %413 = arith.mulf %412, %404 : vector<4x32xf32>
    %c3_80 = arith.constant 3 : index
    %c0_81 = arith.constant 0 : index
    %c0_82 = arith.constant 0 : index
    %414 = vector.load %arg10[%c3_80, %c0_81, %c0_82] : memref<8x4x32xf32, #tpu.memory_space<vmem>>, vector<1x4x32xf32>
    %415 = vector.shape_cast %414 : vector<1x4x32xf32> to vector<4x32xf32>
    %416 = vector.shape_cast %413 : vector<4x32xf32> to vector<1x4x32xf32>
    tpu.vector_store %arg10[%c3_80, %c0_81, %c0_82], %416 {strides = array<i32>} : memref<8x4x32xf32, #tpu.memory_space<vmem>>, vector<1x4x32xf32>,
    %417 = arith.subf %375, %340 : vector<4x32xf32>
    %418 = vector.broadcast %405 : vector<4x1xf32> to vector<4x32xf32>
    %419 = arith.mulf %418, %417 : vector<4x32xf32>
    %420 = arith.addf %340, %419 : vector<4x32xf32>
    %421 = arith.subf %404, %344 : vector<4x32xf32>
    %422 = vector.broadcast %406 : vector<4x1xf32> to vector<4x32xf32>
    %423 = arith.mulf %422, %421 : vector<4x32xf32>
    %424 = arith.addf %344, %423 : vector<4x32xf32>
    %425 = vector.extract_strided_slice %12 {offsets = [20, 0], sizes = [4, 96], strides = [1, 1]} : vector<32x192xf32> to vector<4x96xf32>
    %426 = vector.extract_strided_slice %12 {offsets = [8, 96], sizes = [4, 96], strides = [1, 1]} : vector<32x192xf32> to vector<4x96xf32>
    %cst_83 = arith.constant dense<0.000000e+00> : vector<4x96xf32>
    %427 = tpu.matmul %420, %19, %cst_83 {dimension_numbers = #tpu.dot_dimension_numbers<[1], [0], [0], [1], [0, 0, 1, 1], [], []>} : vector<4x32xf32>, vector<32x96xf32>, vector<4x96xf32> -> vector<4x96xf32>
    %428 = vector.broadcast %21 : vector<1x96xf32> to vector<4x96xf32>
    %429 = arith.addf %427, %428 : vector<4x96xf32>
    %430 = vector.extract_strided_slice %425 {offsets = [0, 0], sizes = [4, 32], strides = [1, 1]} : vector<4x96xf32> to vector<4x32xf32>
    %431 = vector.extract_strided_slice %429 {offsets = [0, 0], sizes = [4, 32], strides = [1, 1]} : vector<4x96xf32> to vector<4x32xf32>
    %432 = arith.addf %430, %431 : vector<4x32xf32>
    %433 = arith.negf %432 : vector<4x32xf32>
    %434 = math.exp %433 : vector<4x32xf32>
    %cst_84 = arith.constant 1.000000e+00 : f32
    %435 = vector.broadcast %cst_84 : f32 to vector<4x32xf32>
    %436 = arith.addf %435, %434 : vector<4x32xf32>
    %437 = arith.divf %435, %436 : vector<4x32xf32>
    %438 = vector.extract_strided_slice %425 {offsets = [0, 32], sizes = [4, 32], strides = [1, 1]} : vector<4x96xf32> to vector<4x32xf32>
    %439 = vector.extract_strided_slice %429 {offsets = [0, 32], sizes = [4, 32], strides = [1, 1]} : vector<4x96xf32> to vector<4x32xf32>
    %440 = arith.addf %438, %439 : vector<4x32xf32>
    %441 = arith.negf %440 : vector<4x32xf32>
    %442 = math.exp %441 : vector<4x32xf32>
    %cst_85 = arith.constant 1.000000e+00 : f32
    %443 = vector.broadcast %cst_85 : f32 to vector<4x32xf32>
    %444 = arith.addf %443, %442 : vector<4x32xf32>
    %445 = arith.divf %443, %444 : vector<4x32xf32>
    %446 = vector.extract_strided_slice %425 {offsets = [0, 64], sizes = [4, 32], strides = [1, 1]} : vector<4x96xf32> to vector<4x32xf32>
    %447 = vector.extract_strided_slice %429 {offsets = [0, 64], sizes = [4, 32], strides = [1, 1]} : vector<4x96xf32> to vector<4x32xf32>
    %448 = arith.mulf %437, %447 : vector<4x32xf32>
    %449 = arith.addf %446, %448 : vector<4x32xf32>
    %450 = math.tanh %449 : vector<4x32xf32>
    %cst_86 = arith.constant 1.000000e+00 : f32
    %451 = vector.broadcast %cst_86 : f32 to vector<4x32xf32>
    %452 = arith.subf %451, %445 : vector<4x32xf32>
    %453 = arith.mulf %452, %450 : vector<4x32xf32>
    %454 = arith.mulf %445, %420 : vector<4x32xf32>
    %455 = arith.addf %453, %454 : vector<4x32xf32>
    %cst_87 = arith.constant dense<0.000000e+00> : vector<4x96xf32>
    %456 = tpu.matmul %424, %20, %cst_87 {dimension_numbers = #tpu.dot_dimension_numbers<[1], [0], [0], [1], [0, 0, 1, 1], [], []>} : vector<4x32xf32>, vector<32x96xf32>, vector<4x96xf32> -> vector<4x96xf32>
    %457 = vector.broadcast %22 : vector<1x96xf32> to vector<4x96xf32>
    %458 = arith.addf %456, %457 : vector<4x96xf32>
    %459 = vector.extract_strided_slice %426 {offsets = [0, 0], sizes = [4, 32], strides = [1, 1]} : vector<4x96xf32> to vector<4x32xf32>
    %460 = vector.extract_strided_slice %458 {offsets = [0, 0], sizes = [4, 32], strides = [1, 1]} : vector<4x96xf32> to vector<4x32xf32>
    %461 = arith.addf %459, %460 : vector<4x32xf32>
    %462 = arith.negf %461 : vector<4x32xf32>
    %463 = math.exp %462 : vector<4x32xf32>
    %cst_88 = arith.constant 1.000000e+00 : f32
    %464 = vector.broadcast %cst_88 : f32 to vector<4x32xf32>
    %465 = arith.addf %464, %463 : vector<4x32xf32>
    %466 = arith.divf %464, %465 : vector<4x32xf32>
    %467 = vector.extract_strided_slice %426 {offsets = [0, 32], sizes = [4, 32], strides = [1, 1]} : vector<4x96xf32> to vector<4x32xf32>
    %468 = vector.extract_strided_slice %458 {offsets = [0, 32], sizes = [4, 32], strides = [1, 1]} : vector<4x96xf32> to vector<4x32xf32>
    %469 = arith.addf %467, %468 : vector<4x32xf32>
    %470 = arith.negf %469 : vector<4x32xf32>
    %471 = math.exp %470 : vector<4x32xf32>
    %cst_89 = arith.constant 1.000000e+00 : f32
    %472 = vector.broadcast %cst_89 : f32 to vector<4x32xf32>
    %473 = arith.addf %472, %471 : vector<4x32xf32>
    %474 = arith.divf %472, %473 : vector<4x32xf32>
    %475 = vector.extract_strided_slice %426 {offsets = [0, 64], sizes = [4, 32], strides = [1, 1]} : vector<4x96xf32> to vector<4x32xf32>
    %476 = vector.extract_strided_slice %458 {offsets = [0, 64], sizes = [4, 32], strides = [1, 1]} : vector<4x96xf32> to vector<4x32xf32>
    %477 = arith.mulf %466, %476 : vector<4x32xf32>
    %478 = arith.addf %475, %477 : vector<4x32xf32>
    %479 = math.tanh %478 : vector<4x32xf32>
    %cst_90 = arith.constant 1.000000e+00 : f32
    %480 = vector.broadcast %cst_90 : f32 to vector<4x32xf32>
    %481 = arith.subf %480, %474 : vector<4x32xf32>
    %482 = arith.mulf %481, %479 : vector<4x32xf32>
    %483 = arith.mulf %474, %424 : vector<4x32xf32>
    %484 = arith.addf %482, %483 : vector<4x32xf32>
    %485 = vector.extract_strided_slice %18 {offsets = [0, 5], sizes = [4, 1], strides = [1, 1]} : vector<4x8xf32> to vector<4x1xf32>
    %486 = vector.extract_strided_slice %18 {offsets = [0, 2], sizes = [4, 1], strides = [1, 1]} : vector<4x8xf32> to vector<4x1xf32>
    %487 = vector.broadcast %485 : vector<4x1xf32> to vector<4x32xf32>
    %488 = arith.mulf %487, %455 : vector<4x32xf32>
    %c5_91 = arith.constant 5 : index
    %c0_92 = arith.constant 0 : index
    %c0_93 = arith.constant 0 : index
    %489 = vector.load %arg9[%c5_91, %c0_92, %c0_93] : memref<8x4x32xf32, #tpu.memory_space<vmem>>, vector<1x4x32xf32>
    %490 = vector.shape_cast %489 : vector<1x4x32xf32> to vector<4x32xf32>
    %491 = vector.shape_cast %488 : vector<4x32xf32> to vector<1x4x32xf32>
    tpu.vector_store %arg9[%c5_91, %c0_92, %c0_93], %491 {strides = array<i32>} : memref<8x4x32xf32, #tpu.memory_space<vmem>>, vector<1x4x32xf32>,
    %492 = vector.broadcast %486 : vector<4x1xf32> to vector<4x32xf32>
    %493 = arith.mulf %492, %484 : vector<4x32xf32>
    %c2_94 = arith.constant 2 : index
    %c0_95 = arith.constant 0 : index
    %c0_96 = arith.constant 0 : index
    %494 = vector.load %arg10[%c2_94, %c0_95, %c0_96] : memref<8x4x32xf32, #tpu.memory_space<vmem>>, vector<1x4x32xf32>
    %495 = vector.shape_cast %494 : vector<1x4x32xf32> to vector<4x32xf32>
    %496 = vector.shape_cast %493 : vector<4x32xf32> to vector<1x4x32xf32>
    tpu.vector_store %arg10[%c2_94, %c0_95, %c0_96], %496 {strides = array<i32>} : memref<8x4x32xf32, #tpu.memory_space<vmem>>, vector<1x4x32xf32>,
    %497 = arith.subf %455, %420 : vector<4x32xf32>
    %498 = vector.broadcast %485 : vector<4x1xf32> to vector<4x32xf32>
    %499 = arith.mulf %498, %497 : vector<4x32xf32>
    %500 = arith.addf %420, %499 : vector<4x32xf32>
    %501 = arith.subf %484, %424 : vector<4x32xf32>
    %502 = vector.broadcast %486 : vector<4x1xf32> to vector<4x32xf32>
    %503 = arith.mulf %502, %501 : vector<4x32xf32>
    %504 = arith.addf %424, %503 : vector<4x32xf32>
    %505 = vector.extract_strided_slice %12 {offsets = [24, 0], sizes = [4, 96], strides = [1, 1]} : vector<32x192xf32> to vector<4x96xf32>
    %506 = vector.extract_strided_slice %12 {offsets = [4, 96], sizes = [4, 96], strides = [1, 1]} : vector<32x192xf32> to vector<4x96xf32>
    %cst_97 = arith.constant dense<0.000000e+00> : vector<4x96xf32>
    %507 = tpu.matmul %500, %19, %cst_97 {dimension_numbers = #tpu.dot_dimension_numbers<[1], [0], [0], [1], [0, 0, 1, 1], [], []>} : vector<4x32xf32>, vector<32x96xf32>, vector<4x96xf32> -> vector<4x96xf32>
    %508 = vector.broadcast %21 : vector<1x96xf32> to vector<4x96xf32>
    %509 = arith.addf %507, %508 : vector<4x96xf32>
    %510 = vector.extract_strided_slice %505 {offsets = [0, 0], sizes = [4, 32], strides = [1, 1]} : vector<4x96xf32> to vector<4x32xf32>
    %511 = vector.extract_strided_slice %509 {offsets = [0, 0], sizes = [4, 32], strides = [1, 1]} : vector<4x96xf32> to vector<4x32xf32>
    %512 = arith.addf %510, %511 : vector<4x32xf32>
    %513 = arith.negf %512 : vector<4x32xf32>
    %514 = math.exp %513 : vector<4x32xf32>
    %cst_98 = arith.constant 1.000000e+00 : f32
    %515 = vector.broadcast %cst_98 : f32 to vector<4x32xf32>
    %516 = arith.addf %515, %514 : vector<4x32xf32>
    %517 = arith.divf %515, %516 : vector<4x32xf32>
    %518 = vector.extract_strided_slice %505 {offsets = [0, 32], sizes = [4, 32], strides = [1, 1]} : vector<4x96xf32> to vector<4x32xf32>
    %519 = vector.extract_strided_slice %509 {offsets = [0, 32], sizes = [4, 32], strides = [1, 1]} : vector<4x96xf32> to vector<4x32xf32>
    %520 = arith.addf %518, %519 : vector<4x32xf32>
    %521 = arith.negf %520 : vector<4x32xf32>
    %522 = math.exp %521 : vector<4x32xf32>
    %cst_99 = arith.constant 1.000000e+00 : f32
    %523 = vector.broadcast %cst_99 : f32 to vector<4x32xf32>
    %524 = arith.addf %523, %522 : vector<4x32xf32>
    %525 = arith.divf %523, %524 : vector<4x32xf32>
    %526 = vector.extract_strided_slice %505 {offsets = [0, 64], sizes = [4, 32], strides = [1, 1]} : vector<4x96xf32> to vector<4x32xf32>
    %527 = vector.extract_strided_slice %509 {offsets = [0, 64], sizes = [4, 32], strides = [1, 1]} : vector<4x96xf32> to vector<4x32xf32>
    %528 = arith.mulf %517, %527 : vector<4x32xf32>
    %529 = arith.addf %526, %528 : vector<4x32xf32>
    %530 = math.tanh %529 : vector<4x32xf32>
    %cst_100 = arith.constant 1.000000e+00 : f32
    %531 = vector.broadcast %cst_100 : f32 to vector<4x32xf32>
    %532 = arith.subf %531, %525 : vector<4x32xf32>
    %533 = arith.mulf %532, %530 : vector<4x32xf32>
    %534 = arith.mulf %525, %500 : vector<4x32xf32>
    %535 = arith.addf %533, %534 : vector<4x32xf32>
    %cst_101 = arith.constant dense<0.000000e+00> : vector<4x96xf32>
    %536 = tpu.matmul %504, %20, %cst_101 {dimension_numbers = #tpu.dot_dimension_numbers<[1], [0], [0], [1], [0, 0, 1, 1], [], []>} : vector<4x32xf32>, vector<32x96xf32>, vector<4x96xf32> -> vector<4x96xf32>
    %537 = vector.broadcast %22 : vector<1x96xf32> to vector<4x96xf32>
    %538 = arith.addf %536, %537 : vector<4x96xf32>
    %539 = vector.extract_strided_slice %506 {offsets = [0, 0], sizes = [4, 32], strides = [1, 1]} : vector<4x96xf32> to vector<4x32xf32>
    %540 = vector.extract_strided_slice %538 {offsets = [0, 0], sizes = [4, 32], strides = [1, 1]} : vector<4x96xf32> to vector<4x32xf32>
    %541 = arith.addf %539, %540 : vector<4x32xf32>
    %542 = arith.negf %541 : vector<4x32xf32>
    %543 = math.exp %542 : vector<4x32xf32>
    %cst_102 = arith.constant 1.000000e+00 : f32
    %544 = vector.broadcast %cst_102 : f32 to vector<4x32xf32>
    %545 = arith.addf %544, %543 : vector<4x32xf32>
    %546 = arith.divf %544, %545 : vector<4x32xf32>
    %547 = vector.extract_strided_slice %506 {offsets = [0, 32], sizes = [4, 32], strides = [1, 1]} : vector<4x96xf32> to vector<4x32xf32>
    %548 = vector.extract_strided_slice %538 {offsets = [0, 32], sizes = [4, 32], strides = [1, 1]} : vector<4x96xf32> to vector<4x32xf32>
    %549 = arith.addf %547, %548 : vector<4x32xf32>
    %550 = arith.negf %549 : vector<4x32xf32>
    %551 = math.exp %550 : vector<4x32xf32>
    %cst_103 = arith.constant 1.000000e+00 : f32
    %552 = vector.broadcast %cst_103 : f32 to vector<4x32xf32>
    %553 = arith.addf %552, %551 : vector<4x32xf32>
    %554 = arith.divf %552, %553 : vector<4x32xf32>
    %555 = vector.extract_strided_slice %506 {offsets = [0, 64], sizes = [4, 32], strides = [1, 1]} : vector<4x96xf32> to vector<4x32xf32>
    %556 = vector.extract_strided_slice %538 {offsets = [0, 64], sizes = [4, 32], strides = [1, 1]} : vector<4x96xf32> to vector<4x32xf32>
    %557 = arith.mulf %546, %556 : vector<4x32xf32>
    %558 = arith.addf %555, %557 : vector<4x32xf32>
    %559 = math.tanh %558 : vector<4x32xf32>
    %cst_104 = arith.constant 1.000000e+00 : f32
    %560 = vector.broadcast %cst_104 : f32 to vector<4x32xf32>
    %561 = arith.subf %560, %554 : vector<4x32xf32>
    %562 = arith.mulf %561, %559 : vector<4x32xf32>
    %563 = arith.mulf %554, %504 : vector<4x32xf32>
    %564 = arith.addf %562, %563 : vector<4x32xf32>
    %565 = vector.extract_strided_slice %18 {offsets = [0, 6], sizes = [4, 1], strides = [1, 1]} : vector<4x8xf32> to vector<4x1xf32>
    %566 = vector.extract_strided_slice %18 {offsets = [0, 1], sizes = [4, 1], strides = [1, 1]} : vector<4x8xf32> to vector<4x1xf32>
    %567 = vector.broadcast %565 : vector<4x1xf32> to vector<4x32xf32>
    %568 = arith.mulf %567, %535 : vector<4x32xf32>
    %c6_105 = arith.constant 6 : index
    %c0_106 = arith.constant 0 : index
    %c0_107 = arith.constant 0 : index
    %569 = vector.load %arg9[%c6_105, %c0_106, %c0_107] : memref<8x4x32xf32, #tpu.memory_space<vmem>>, vector<1x4x32xf32>
    %570 = vector.shape_cast %569 : vector<1x4x32xf32> to vector<4x32xf32>
    %571 = vector.shape_cast %568 : vector<4x32xf32> to vector<1x4x32xf32>
    tpu.vector_store %arg9[%c6_105, %c0_106, %c0_107], %571 {strides = array<i32>} : memref<8x4x32xf32, #tpu.memory_space<vmem>>, vector<1x4x32xf32>,
    %572 = vector.broadcast %566 : vector<4x1xf32> to vector<4x32xf32>
    %573 = arith.mulf %572, %564 : vector<4x32xf32>
    %c1_108 = arith.constant 1 : index
    %c0_109 = arith.constant 0 : index
    %c0_110 = arith.constant 0 : index
    %574 = vector.load %arg10[%c1_108, %c0_109, %c0_110] : memref<8x4x32xf32, #tpu.memory_space<vmem>>, vector<1x4x32xf32>
    %575 = vector.shape_cast %574 : vector<1x4x32xf32> to vector<4x32xf32>
    %576 = vector.shape_cast %573 : vector<4x32xf32> to vector<1x4x32xf32>
    tpu.vector_store %arg10[%c1_108, %c0_109, %c0_110], %576 {strides = array<i32>} : memref<8x4x32xf32, #tpu.memory_space<vmem>>, vector<1x4x32xf32>,
    %577 = arith.subf %535, %500 : vector<4x32xf32>
    %578 = vector.broadcast %565 : vector<4x1xf32> to vector<4x32xf32>
    %579 = arith.mulf %578, %577 : vector<4x32xf32>
    %580 = arith.addf %500, %579 : vector<4x32xf32>
    %581 = arith.subf %564, %504 : vector<4x32xf32>
    %582 = vector.broadcast %566 : vector<4x1xf32> to vector<4x32xf32>
    %583 = arith.mulf %582, %581 : vector<4x32xf32>
    %584 = arith.addf %504, %583 : vector<4x32xf32>
    %585 = vector.extract_strided_slice %12 {offsets = [28, 0], sizes = [4, 96], strides = [1, 1]} : vector<32x192xf32> to vector<4x96xf32>
    %586 = vector.extract_strided_slice %12 {offsets = [0, 96], sizes = [4, 96], strides = [1, 1]} : vector<32x192xf32> to vector<4x96xf32>
    %cst_111 = arith.constant dense<0.000000e+00> : vector<4x96xf32>
    %587 = tpu.matmul %580, %19, %cst_111 {dimension_numbers = #tpu.dot_dimension_numbers<[1], [0], [0], [1], [0, 0, 1, 1], [], []>} : vector<4x32xf32>, vector<32x96xf32>, vector<4x96xf32> -> vector<4x96xf32>
    %588 = vector.broadcast %21 : vector<1x96xf32> to vector<4x96xf32>
    %589 = arith.addf %587, %588 : vector<4x96xf32>
    %590 = vector.extract_strided_slice %585 {offsets = [0, 0], sizes = [4, 32], strides = [1, 1]} : vector<4x96xf32> to vector<4x32xf32>
    %591 = vector.extract_strided_slice %589 {offsets = [0, 0], sizes = [4, 32], strides = [1, 1]} : vector<4x96xf32> to vector<4x32xf32>
    %592 = arith.addf %590, %591 : vector<4x32xf32>
    %593 = arith.negf %592 : vector<4x32xf32>
    %594 = math.exp %593 : vector<4x32xf32>
    %cst_112 = arith.constant 1.000000e+00 : f32
    %595 = vector.broadcast %cst_112 : f32 to vector<4x32xf32>
    %596 = arith.addf %595, %594 : vector<4x32xf32>
    %597 = arith.divf %595, %596 : vector<4x32xf32>
    %598 = vector.extract_strided_slice %585 {offsets = [0, 32], sizes = [4, 32], strides = [1, 1]} : vector<4x96xf32> to vector<4x32xf32>
    %599 = vector.extract_strided_slice %589 {offsets = [0, 32], sizes = [4, 32], strides = [1, 1]} : vector<4x96xf32> to vector<4x32xf32>
    %600 = arith.addf %598, %599 : vector<4x32xf32>
    %601 = arith.negf %600 : vector<4x32xf32>
    %602 = math.exp %601 : vector<4x32xf32>
    %cst_113 = arith.constant 1.000000e+00 : f32
    %603 = vector.broadcast %cst_113 : f32 to vector<4x32xf32>
    %604 = arith.addf %603, %602 : vector<4x32xf32>
    %605 = arith.divf %603, %604 : vector<4x32xf32>
    %606 = vector.extract_strided_slice %585 {offsets = [0, 64], sizes = [4, 32], strides = [1, 1]} : vector<4x96xf32> to vector<4x32xf32>
    %607 = vector.extract_strided_slice %589 {offsets = [0, 64], sizes = [4, 32], strides = [1, 1]} : vector<4x96xf32> to vector<4x32xf32>
    %608 = arith.mulf %597, %607 : vector<4x32xf32>
    %609 = arith.addf %606, %608 : vector<4x32xf32>
    %610 = math.tanh %609 : vector<4x32xf32>
    %cst_114 = arith.constant 1.000000e+00 : f32
    %611 = vector.broadcast %cst_114 : f32 to vector<4x32xf32>
    %612 = arith.subf %611, %605 : vector<4x32xf32>
    %613 = arith.mulf %612, %610 : vector<4x32xf32>
    %614 = arith.mulf %605, %580 : vector<4x32xf32>
    %615 = arith.addf %613, %614 : vector<4x32xf32>
    %cst_115 = arith.constant dense<0.000000e+00> : vector<4x96xf32>
    %616 = tpu.matmul %584, %20, %cst_115 {dimension_numbers = #tpu.dot_dimension_numbers<[1], [0], [0], [1], [0, 0, 1, 1], [], []>} : vector<4x32xf32>, vector<32x96xf32>, vector<4x96xf32> -> vector<4x96xf32>
    %617 = vector.broadcast %22 : vector<1x96xf32> to vector<4x96xf32>
    %618 = arith.addf %616, %617 : vector<4x96xf32>
    %619 = vector.extract_strided_slice %586 {offsets = [0, 0], sizes = [4, 32], strides = [1, 1]} : vector<4x96xf32> to vector<4x32xf32>
    %620 = vector.extract_strided_slice %618 {offsets = [0, 0], sizes = [4, 32], strides = [1, 1]} : vector<4x96xf32> to vector<4x32xf32>
    %621 = arith.addf %619, %620 : vector<4x32xf32>
    %622 = arith.negf %621 : vector<4x32xf32>
    %623 = math.exp %622 : vector<4x32xf32>
    %cst_116 = arith.constant 1.000000e+00 : f32
    %624 = vector.broadcast %cst_116 : f32 to vector<4x32xf32>
    %625 = arith.addf %624, %623 : vector<4x32xf32>
    %626 = arith.divf %624, %625 : vector<4x32xf32>
    %627 = vector.extract_strided_slice %586 {offsets = [0, 32], sizes = [4, 32], strides = [1, 1]} : vector<4x96xf32> to vector<4x32xf32>
    %628 = vector.extract_strided_slice %618 {offsets = [0, 32], sizes = [4, 32], strides = [1, 1]} : vector<4x96xf32> to vector<4x32xf32>
    %629 = arith.addf %627, %628 : vector<4x32xf32>
    %630 = arith.negf %629 : vector<4x32xf32>
    %631 = math.exp %630 : vector<4x32xf32>
    %cst_117 = arith.constant 1.000000e+00 : f32
    %632 = vector.broadcast %cst_117 : f32 to vector<4x32xf32>
    %633 = arith.addf %632, %631 : vector<4x32xf32>
    %634 = arith.divf %632, %633 : vector<4x32xf32>
    %635 = vector.extract_strided_slice %586 {offsets = [0, 64], sizes = [4, 32], strides = [1, 1]} : vector<4x96xf32> to vector<4x32xf32>
    %636 = vector.extract_strided_slice %618 {offsets = [0, 64], sizes = [4, 32], strides = [1, 1]} : vector<4x96xf32> to vector<4x32xf32>
    %637 = arith.mulf %626, %636 : vector<4x32xf32>
    %638 = arith.addf %635, %637 : vector<4x32xf32>
    %639 = math.tanh %638 : vector<4x32xf32>
    %cst_118 = arith.constant 1.000000e+00 : f32
    %640 = vector.broadcast %cst_118 : f32 to vector<4x32xf32>
    %641 = arith.subf %640, %634 : vector<4x32xf32>
    %642 = arith.mulf %641, %639 : vector<4x32xf32>
    %643 = arith.mulf %634, %584 : vector<4x32xf32>
    %644 = arith.addf %642, %643 : vector<4x32xf32>
    %645 = vector.extract_strided_slice %18 {offsets = [0, 7], sizes = [4, 1], strides = [1, 1]} : vector<4x8xf32> to vector<4x1xf32>
    %646 = vector.extract_strided_slice %18 {offsets = [0, 0], sizes = [4, 1], strides = [1, 1]} : vector<4x8xf32> to vector<4x1xf32>
    %647 = vector.broadcast %645 : vector<4x1xf32> to vector<4x32xf32>
    %648 = arith.mulf %647, %615 : vector<4x32xf32>
    %c7_119 = arith.constant 7 : index
    %c0_120 = arith.constant 0 : index
    %c0_121 = arith.constant 0 : index
    %649 = vector.load %arg9[%c7_119, %c0_120, %c0_121] : memref<8x4x32xf32, #tpu.memory_space<vmem>>, vector<1x4x32xf32>
    %650 = vector.shape_cast %649 : vector<1x4x32xf32> to vector<4x32xf32>
    %651 = vector.shape_cast %648 : vector<4x32xf32> to vector<1x4x32xf32>
    tpu.vector_store %arg9[%c7_119, %c0_120, %c0_121], %651 {strides = array<i32>} : memref<8x4x32xf32, #tpu.memory_space<vmem>>, vector<1x4x32xf32>,
    %652 = vector.broadcast %646 : vector<4x1xf32> to vector<4x32xf32>
    %653 = arith.mulf %652, %644 : vector<4x32xf32>
    %c0_122 = arith.constant 0 : index
    %c0_123 = arith.constant 0 : index
    %c0_124 = arith.constant 0 : index
    %654 = vector.load %arg10[%c0_122, %c0_123, %c0_124] : memref<8x4x32xf32, #tpu.memory_space<vmem>>, vector<1x4x32xf32>
    %655 = vector.shape_cast %654 : vector<1x4x32xf32> to vector<4x32xf32>
    %656 = vector.shape_cast %653 : vector<4x32xf32> to vector<1x4x32xf32>
    tpu.vector_store %arg10[%c0_122, %c0_123, %c0_124], %656 {strides = array<i32>} : memref<8x4x32xf32, #tpu.memory_space<vmem>>, vector<1x4x32xf32>,
    %657 = arith.subf %615, %580 : vector<4x32xf32>
    %658 = vector.broadcast %645 : vector<4x1xf32> to vector<4x32xf32>
    %659 = arith.mulf %658, %657 : vector<4x32xf32>
    %660 = arith.addf %580, %659 : vector<4x32xf32>
    %661 = arith.subf %644, %584 : vector<4x32xf32>
    %662 = vector.broadcast %646 : vector<4x1xf32> to vector<4x32xf32>
    %663 = arith.mulf %662, %661 : vector<4x32xf32>
    %664 = arith.addf %584, %663 : vector<4x32xf32>
    %c0_125 = arith.constant 0 : index
    %c0_126 = arith.constant 0 : index
    %c0_127 = arith.constant 0 : index
    %665 = vector.load %arg11[%c0_125, %c0_126, %c0_127] : memref<2x4x32xf32, #tpu.memory_space<vmem>>, vector<1x4x32xf32>
    %666 = vector.shape_cast %665 : vector<1x4x32xf32> to vector<4x32xf32>
    %667 = vector.shape_cast %660 : vector<4x32xf32> to vector<1x4x32xf32>
    tpu.vector_store %arg11[%c0_125, %c0_126, %c0_127], %667 {strides = array<i32>} : memref<2x4x32xf32, #tpu.memory_space<vmem>>, vector<1x4x32xf32>,
    %c1_128 = arith.constant 1 : index
    %c0_129 = arith.constant 0 : index
    %c0_130 = arith.constant 0 : index
    %668 = vector.load %arg11[%c1_128, %c0_129, %c0_130] : memref<2x4x32xf32, #tpu.memory_space<vmem>>, vector<1x4x32xf32>
    %669 = vector.shape_cast %668 : vector<1x4x32xf32> to vector<4x32xf32>
    %670 = vector.shape_cast %664 : vector<4x32xf32> to vector<1x4x32xf32>
    tpu.vector_store %arg11[%c1_128, %c0_129, %c0_130], %670 {strides = array<i32>} : memref<2x4x32xf32, #tpu.memory_space<vmem>>, vector<1x4x32xf32>,
    return
  }
}

</mosaic_0001>

<bundles_post_ra>
// kernel: tpu_custom_call.1
= control target key start
LH: loop header
LB: loop body
LE: loop exit
PB: predicated region body
PF: predicated region fallthrough
CT: control target
= control target key end

     0   :  { %17 = vsyncpa [#allocation3], 0  ;;  %s3696_s0 = inlined_call_operand.vmem [shape: s32[32,1], index: 0, kind: input, shape index: {}]   ;;  %s3697_s1 = inlined_call_operand.vmem [shape: s32[4,1], index: 1, kind: input, shape index: {}]   ;;  %s3698_s2 = inlined_call_operand.hbm [shape: f32[20,32], index: 2, kind: input, shape index: {}]   ;;  %s3699_s3 = inlined_call_operand.hbm [shape: f32[32,192], index: 3, kind: input, shape index: {}]   ;;  %s3700_s4 = inlined_call_operand.vmem [shape: f32[1,192], index: 4, kind: input, shape index: {}]   ;;  %s3701_s5 = inlined_call_operand.vmem [shape: f32[32,96], index: 5, kind: input, shape index: {}]   ;;  %s3702_s6 = inlined_call_operand.vmem [shape: f32[1,96], index: 6, kind: input, shape index: {}]   ;;  %s3703_s7 = inlined_call_operand.hbm [shape: f32[32,96], index: 7, kind: input, shape index: {}]   ;;  %s3704_s8 = inlined_call_operand.vmem [shape: f32[1,96], index: 8, kind: input, shape index: {}]   ;;  %s3705_s9 = inlined_call_operand.hbm [shape: f32[8,4,32], index: 9, kind: output, shape index: {0}]   ;;  %s3706_s10 = inlined_call_operand.hbm [shape: f32[8,4,32], index: 10, kind: output, shape index: {1}]   ;;  %s3707_s11 = inlined_call_operand.hbm [shape: f32[2,4,32], index: 11, kind: output, shape index: {2}]  }
   0x1   :  { %18 = vsyncpa [#allocation6], 0 }
   0x2   :  { %19 = vsyncpa [#allocation4], 0 }
   0x3   :  { %20 = vsyncpa [#allocation10], 0  ;;  %s2966_s17 = smov [#allocation5]  }
   0x4   :  { %s42_s18 = sshll.u32 %s2966_s17, 4  ;;  %s43_s18 = int_to_ptr.vmem [resolvable:$true] %s42_s18 }
   0x5   :  { %s2846_s19 = scalar_lea.vmem %s43_s18, 1024  ;;  %p2851_p1 = scmp.lt.s32.totalorder %s43_s18, %s43_s18 }
   0x6   :  { %p2847_p0 = scmp.ne.s32.totalorder %s43_s18, %s2846_s19  ;;  %p2852_p2 = scmp.lt.s32.totalorder %s2846_s19, %s2846_s19 }
   0x8   :  { %p2853_p3 = por %p2852_p2, %p2851_p1 }
   0xa   :  { %p2854_p4 = pnand %p2853_p3, %p2847_p0 }
   0xc   :  { %2857 = shalt.err (!%p2854_p4)
}
   0xd   :  { %s2967_s20 = smov 256   ;;  %s2968_s21 = smov 16  }
   0xe   :  { %48 = dma.hbm_to_vmem [thread:$0]  %s3699_s3, 1024, %s43_s18, [#allocation6], %s2967_s20, %s2967_s20, %s2968_s21  }
   0xf   :  { %s2969_s24 = smov [#allocation2]  }
  0x10   :  { %s30_s25 = sshll.u32 %s2969_s24, 4  ;;  %s31_s25 = int_to_ptr.vmem [resolvable:$true] %s30_s25 }
  0x11   :  { %s2866_s26 = scalar_lea.vmem %s31_s25, 384  ;;  %p2871_p6 = scmp.lt.s32.totalorder %s31_s25, %s31_s25 }
  0x12   :  { %p2867_p5 = scmp.ne.s32.totalorder %s31_s25, %s2866_s26  ;;  %p2872_p7 = scmp.lt.s32.totalorder %s2866_s26, %s2866_s26 }
  0x14   :  { %p2873_p8 = por %p2872_p7, %p2871_p6 }
  0x16   :  { %p2874_p9 = pnand %p2873_p8, %p2867_p5 }
  0x18   :  { %2877 = shalt.err (!%p2874_p9)
}
  0x19   :  { %s2970_s27 = smov 128   ;;  %s2971_s28 = smov 8  }
  0x1a   :  { %36 = dma.hbm_to_vmem [thread:$0]  %s3698_s2, 384, %s31_s25, [#allocation3], %s2970_s27, %s2970_s27, %s2971_s28  }
  0x1b   :  { %s2972_s12 = smov [#allocation7]  }
  0x1c   :  { %s60_s13 = sshll.u32 %s2972_s12, 4  ;;  %s61_s13 = int_to_ptr.vmem [resolvable:$true] %s60_s13 }
  0x1d   :  { %s2886_s3 = scalar_lea.vmem %s61_s13, 512  ;;  %p2891_p11 = scmp.lt.s32.totalorder %s61_s13, %s61_s13 }
  0x1e   :  { %p2887_p10 = scmp.ne.s32.totalorder %s61_s13, %s2886_s3  ;;  %p2892_p12 = scmp.lt.s32.totalorder %s2886_s3, %s2886_s3 }
  0x20   :  { %p2893_p13 = por %p2892_p12, %p2891_p11 }
  0x22   :  { %p2894_p0 = pnand %p2893_p13, %p2887_p10 }
  0x24   :  { %2897 = shalt.err (!%p2894_p0)
}
  0x25   :  { %66 = dma.hbm_to_vmem [thread:$0]  %s3703_s7, 512, %s61_s13, [#allocation6], %s2970_s27, %s2970_s27, %s2971_s28  }
  0x26   :  { %2958 = dma.done.wait [#allocation3], 384  }
  0x27   :  { %2959 = vsyncadd [#allocation3], 4294966912 }
  0x28   :  { %2960 = dma.done.wait [#allocation6], 1536  }
  0x29   :  { %2961 = vsyncadd [#allocation6], 4294965760  ;;  %v2973_v0 = vmov 0   ;;  %v2974_v1 = vmov 0.0   ;;  %vm124_vm0 = vcmask 1043456   ;;  %v80_v2 = vld [vmem:[%s3696_s0] sm:$0xff]  ;;  %v78_v14 = vlaneseq }
  0x2a   :  { %2691 = vset.pattern.permute.xlu0 %v2973_v0  ;;  %2692 = vset.pattern.permute.xlu1 %v2973_v0  ;;  %v82_v3 = vld [vmem:[%s3696_s0 + $0x10] sm:$0xff]  ;;  %v109_v5 = vld [vmem:[#allocation2 + $0x8] sm:$0xff]  ;;  %v83_v7 = vld [vmem:[%s3696_s0 + $0x18] sm:$0xff]  ;;  %vm111_vm1 = vcmask 162816   ;;  %vm2975_vm6 = vmmov 0   ;;  %vm233_vm7 = vcmask 261120  }
  0x2b   :  { %310 = vmatprep.mubr.f32.mxu1 %v2974_v1  ;;  %85 = vperm.xlu0 %2691, %v80_v2   ;;  %v110_v4 = vld [vmem:[#allocation2 + $0x10] sm:$0xf]  ;;  %v81_v6 = vld [vmem:[%s3696_s0 + $0x8] sm:$0xff]  ;;  %v108_v8 = vld [vmem:[#allocation2] sm:$0xff]  ;;  %v3074_v15 = vand.u32 127, %v78_v14  ;;  %s2976_s12 = smov 64  }
  0x2c   :  { %91 = vperm.xlu1 %2692, %v82_v3   ;;  %2479 = vmatprep.subr.msk.mxu0 %vm124_vm0, %v110_v4  ;;  %v220_v9 = vld [vmem:[#allocation5 + $0x38] sm:$0xff]  ;;  %v219_v10 = vld [vmem:[#allocation5 + $0x30] sm:$0xff]  ;;  %v218_v11 = vld [vmem:[#allocation5 + $0x28] sm:$0xff]  ;;  %v224_v40 = vshrl.u32 %v78_v14, 7  ;;  %s2979_s16 = smov 32   ;;  %vm580_vm9 = vcmask 257024  }
  0x2d   :  { %2480 = vmatpush3.msk.msra.mxu0 %vm124_vm0, %v110_v4  ;;  %270 = vmatprep.subr.mxu1 %v220_v9  ;;  %v217_v12 = vld [vmem:[#allocation5 + $0x20] sm:$0xff]  ;;  %v216_v13 = vld [vmem:[#allocation5 + $0x18] sm:$0xff]  ;;  %v3102_v26 = vld [vmem:[%s3701_s5 + $0x8] sm:$0xff] }
  0x2e   :  { %2481 = vmatprep.subr.mxu0 %v109_v5  ;;  %271 = vmatpush1.msra.mxu1 %v219_v10  ;;  %v3086_v22 = vld [vmem:[%s3701_s5 + $0x18] sm:$0xff]  ;;  %v3093_v24 = vld [vmem:[%s3701_s5 + $0x10] sm:$0xff]  ;;  %v3110_v27 = vld [vmem:[%s3701_s5] sm:$0xff]  ;;  %v229_v41 = vsub.s32 1, %v224_v40  ;;  %v225_v44 = vsub.s32 0, %v224_v40 }
  0x2f   :  { %88 = vperm.xlu0 %2691, %v81_v6   ;;  %2482 = vmatpush3.msra.mxu0 %v109_v5  ;;  %v215_v28 = vld [vmem:[#allocation5 + $0x10] sm:$0xff]  ;;  %v214_v29 = vld [vmem:[#allocation5 + $0x8] sm:$0xff]  ;;  %v213_v30 = vld [vmem:[#allocation5] sm:$0xff] }
  0x30   :  { %94 = vperm.xlu1 %2692, %v83_v7   ;;  %2483 = vmatprep.subr.mxu0 %v108_v8  ;;  %v3129_v35 = vld [vmem:[%s3702_s6] ss:$0 sm:$0xff]  ;;  %v3181_v9 = vld [vmem:[#allocation7 + $0x18] sm:$0xff]  ;;  %v3183_v10 = vld [vmem:[#allocation7 + $0x10] sm:$0xff] }
  0x31   :  { %2484 = vmatpush3.msra.mxu0 %v108_v8  ;;  %272 = vmatprep.subr.mxu1 %v218_v11  ;;  %v335_v39 = vld [vmem:[%s3697_s1] sm:$0xf]  ;;  %s2977_s1 = smov 96  }
  0x32   :  { %2491 = vmatprep.subr.mxu0 %v2974_v1  ;;  %273 = vmatpush1.msra.mxu1 %v217_v12  ;;  %v221_v42 = vld [vmem:[%s3700_s4] sm:$0x3]  ;;  %v3191_v12 = vld [vmem:[#allocation7] sm:$0xff] }
  0x33   :  { %274 = vmatprep.subr.mxu1 %v216_v13  ;;  %v3153_v43 = vrot.slane %v221_v42, %v229_v41  ;;  %v226_v45 = vrot.slane %v221_v42, %v225_v44  ;;  %v3187_v11 = vld [vmem:[#allocation7 + $0x8] sm:$0xff] }
  0x34   :  { %275 = vmatpush1.msra.mxu1 %v215_v28  ;;  %v3232_v40 = vld [vmem:[%s3704_s8] ss:$0 sm:$0xff] }
  0x35   :  { %276 = vmatprep.subr.mxu1 %v214_v29 }
  0x36   :  { %277 = vmatpush1.msra.mxu1 %v213_v30 }
  0x37   :  { %2513 = vmatprep.subr.mxu1 %v2974_v1 }
  0xa6   :  { %v86_v16 = vpop.permute.xlu0 %85 }
  0xa7   :  { %v92_v17 = vpop.permute.xlu1 %91  ;;  %vm96_vm2 = vcmp.eq.s32.totalorder %v3074_v15, %v86_v16 }
  0xa8   :  { %v2338_v18 = vsel %vm96_vm2, 1.0, %v2974_v1  ;;  %vm98_vm3 = vcmp.eq.s32.totalorder %v3074_v15, %v92_v17 }
  0xa9   :  { %2485 = vmatprep.mubr.msk.f32.mxu0 %vm111_vm1, %v2338_v18  ;;  %v2340_v21 = vsel %vm98_vm3, 1.0, %v2974_v1 }
  0xaa   :  { %v89_v19 = vpop.permute.xlu0 %88 }
  0xab   :  { %v95_v20 = vpop.permute.xlu1 %94  ;;  %vm97_vm4 = vcmp.eq.s32.totalorder %v3074_v15, %v89_v19 }
  0xac   :  { %vm99_vm5 = vcmp.eq.s32.totalorder %v3074_v15, %v95_v20  ;;  %v2339_v23 = vsel %vm97_vm4, 1.0, %v2974_v1 }
  0xad   :  { %2486 = vmatmul.mubr.msk.f32.vlgmr.msra.gmra.mxu0 %vm111_vm1, %v2339_v23  ;;  %v2341_v25 = vsel %vm99_vm5, 1.0, %v2974_v1 }
  0xae   :  { %2492 = vmatpush3.msra.mxu0 %v3086_v22  ;;  %2488 = vmatprep.mubr.msk.f32.mxu0 %vm111_vm1, %v2340_v21  ;;  %v2978_v21 = vmov 1  }
  0xaf   :  { %2493 = vmatprep.subr.mxu0 %v2974_v1 }
  0xb0   :  { %2494 = vmatpush3.msra.mxu0 %v3093_v24 }
  0xb1   :  { %2489 = vmatmul.mubr.msk.f32.gmra.mxu0 %vm111_vm1, %v2341_v25  ;;  %2495 = vmatprep.subr.mxu0 %v2974_v1 }
  0xb2   :  { %2496 = vmatpush3.msra.mxu0 %v3102_v26  ;;  %2499 = vmatprep.mubr.msk.f32.mxu0 %vm2975_vm6, %v2974_v1 }
  0xb3   :  { %2497 = vmatprep.subr.mxu0 %v2974_v1 }
  0xb4   :  { %2498 = vmatpush3.msra.mxu0 %v3110_v27 }
  0xb5   :  { %2500 = vmatmul.mubr.f32.vlgmr.msra.gmra.mxu0 %v2974_v1  ;;  %2502 = vmatprep.subr.mxu0 %v2974_v1 }
  0xb6   :  { %2510 = vmatprep.mubr.msk.f32.mxu0 %vm2975_vm6, %v2974_v1  ;;  %2503 = vmatpush3.msra.mxu0 %v3181_v9 }
  0xb7   :  { %2504 = vmatprep.subr.mxu0 %v2974_v1 }
  0xb8   :  { %2505 = vmatpush3.msra.mxu0 %v3183_v10 }
  0xb9   :  { %2506 = vmatprep.subr.mxu0 %v2974_v1 }
  0xba   :  { %2507 = vmatpush3.msra.mxu0 %v3187_v11 }
  0xbb   :  { %2508 = vmatprep.subr.mxu0 %v2974_v1 }
  0xbc   :  { %2509 = vmatpush3.msra.mxu0 %v3191_v12 }
  0xbd   :  { %2511 = vmatmul.mubr.f32.vlgmr.msra.gmra.mxu0 %v2974_v1  ;;  %2524 = vmatprep.subr.mxu0 %v2974_v1 }
  0xbe   :  { %2525 = vmatpush3.msra.mxu0 %v3181_v9  ;;  %2532 = vmatprep.mubr.msk.f32.mxu0 %vm2975_vm6, %v2974_v1 }
  0xbf   :  { %2526 = vmatprep.subr.mxu0 %v2974_v1 }
  0xc0   :  { %2527 = vmatpush3.msra.mxu0 %v3183_v10 }
  0xc1   :  { %2528 = vmatprep.subr.mxu0 %v2974_v1 }
  0xc2   :  { %2529 = vmatpush3.msra.mxu0 %v3187_v11 }
  0xc3   :  { %2530 = vmatprep.subr.mxu0 %v2974_v1 }
  0xc4   :  { %2531 = vmatpush3.msra.mxu0 %v3191_v12 }
  0xc5   :  { %2546 = vmatprep.subr.mxu0 %v2974_v1 }
 0x16d   :  { %v2487_v31 = vpop.f32.mrf.mxu0 }
 0x16f   :  { %v194_v32 = vpop.f32.mrf.mxu0 }
 0x170   :  { %2347 = vmatmul.mubr.msk.f32.vlgmr.msra.gmra.mxu1 %vm233_vm7, %v194_v32 }
 0x171   :  { %v2490_v33 = vpop.f32.mrf.mxu0  ;;  %316 = vmatprep.mubr.f32.mxu1 %v2974_v1  ;;  %2514 = vmatpush3.msra.mxu1 %v3086_v22 }
 0x172   :  { %2515 = vmatprep.subr.mxu1 %v2974_v1 }
 0x173   :  { %v204_v34 = vpop.f32.mrf.mxu0  ;;  %2516 = vmatpush3.msra.mxu1 %v3093_v24 }
 0x174   :  { %2348 = vmatmul.mubr.msk.f32.gmra.mxu1 %vm233_vm7, %v2487_v31  ;;  %2517 = vmatprep.subr.mxu1 %v2974_v1 }
 0x175   :  { %v427_v36 = vpop.f32.mrf.mxu0  ;;  %322 = vmatprep.mubr.f32.mxu1 %v2974_v1  ;;  %2518 = vmatpush3.msra.mxu1 %v3102_v26 }
 0x176   :  { %v428_v37 = vadd.f32 %v3129_v35, %v427_v36  ;;  %2519 = vmatprep.subr.mxu1 %v2974_v1 }
 0x177   :  { %v2501_v38 = vpop.f32.mrf.mxu0  ;;  %2520 = vmatpush3.msra.mxu1 %v3110_v27 }
 0x178   :  { %439 = vrot.lane.b32.xlu0 %v428_v37, %s2976_s12  ;;  %2349 = vmatmul.mubr.msk.f32.gmra.mxu1 %vm233_vm7, %v204_v34 }
 0x179   :  { %328 = vmatprep.mubr.f32.mxu1 %v2974_v1  ;;  %2535 = vmatprep.subr.mxu1 %v2974_v1 }
 0x17c   :  { %337 = vperm.xlu0 %2691, %v335_v39   ;;  %2350 = vmatmul.mubr.msk.f32.gmra.mxu1 %vm233_vm7, %v2490_v33 }
 0x17d   :  { %2521 = vmatprep.mubr.msk.f32.mxu1 %vm2975_vm6, %v2974_v1  ;;  %v529_v25 = vpop.f32.mrf.mxu0 }
 0x17e   :  { %v530_v42 = vadd.f32 %v3232_v40, %v529_v25 }
 0x17f   :  { %v2512_v29 = vpop.f32.mrf.mxu0 }
 0x180   :  { %v534_v44 = vrot.slane %v530_v42, 4 }
 0x1ea   :  { %v440_v0 = vpop.permute.xlu0 %439 }
 0x1f7   :  { %v338_v3 = vpop.permute.xlu0 %337 }
 0x1f8   :  { %vm339_vm8 = vcmp.lt.s32.totalorder %v3074_v15, %v338_v3 }
 0x1f9   :  { %v3176_v5 = vsel %vm339_vm8, 1.0, %v2974_v1 }
 0x230   :  { %v312_v46 = vpop.f32.mrf.mxu1 }
 0x231   :  { %v3155_v47 = vadd.f32 %v312_v46, %v226_v45 }
 0x232   :  { %v314_v48 = vpop.f32.mrf.mxu1 }
 0x233   :  { %v431_v49 = vadd.f32 %v428_v37, %v3155_v47  ;;  %v3159_v50 = vadd.f32 %v314_v48, %v3153_v43 }
 0x234   :  { %v318_v51 = vpop.f32.mrf.mxu1 }
 0x235   :  { %v2353_v52 = vmul.f32 -1.442695, %v431_v49  ;;  %v3161_v53 = vadd.f32 %v318_v51, %v226_v45 }
 0x236   :  { %v320_v54 = vpop.f32.mrf.mxu1 }
 0x237   :  { %2700 = vpow2.f32 %v2353_v52  ;;  %v3164_v55 = vadd.f32 %v320_v54, %v3153_v43 }
 0x238   :  { %v324_v56 = vpop.f32.mrf.mxu1 }
 0x239   :  { %v3166_v57 = vadd.f32 %v324_v56, %v226_v45 }
 0x23a   :  { %v326_v58 = vpop.f32.mrf.mxu1 }
 0x23b   :  { %v3169_v59 = vadd.f32 %v326_v58, %v3153_v43 }
 0x23c   :  { %v330_v60 = vpop.f32.mrf.mxu1 }
 0x23d   :  { %v3171_v61 = vadd.f32 %v330_v60, %v226_v45 }
 0x23e   :  { %v332_v23 = vpop.f32.mrf.mxu1 }
 0x244   :  { %v2701_v62 = vpop.eup %2700 }
 0x245   :  { %v435_v63 = vadd.f32 1.0, %v2701_v62 }
 0x247   :  { %2702 = vrcp.f32 %v435_v63 }
 0x254   :  { %v2703_v2 = vpop.eup %2702 }
 0x255   :  { %v442_v4 = vmul.f32 %v2703_v2, %v440_v0  ;;  %v449_v13 = vsub.f32 1.0, %v2703_v2  ;;  %v455_v15 = vmul.f32 0.0, %v2703_v2 }
 0x257   :  { %444 = vrot.lane.b32.xlu1 %v442_v4, %s2976_s12 }
 0x25b   :  { %572 = vperm.xlu1 %2692, %v3176_v5  }
 0x25f   :  { %2693 = vset.pattern.permute.xlu1 %v2978_v21  ;;  %v3256_v21 = vadd.f32 %v332_v23, %v3153_v43 }
 0x2c9   :  { %v445_v6 = vpop.permute.xlu1 %444 }
 0x2ca   :  { %v447_v7 = vadd.f32 %v445_v6, %v3155_v47 }
 0x2cc   :  { %2704 = vtanh.f32 %v447_v7  ;;  %v2980_v7 = vmov 7  }
 0x2d6   :  { %v3201_v18 = vpop.permute.xlu1 %572 }
 0x2d9   :  { %v2705_v8 = vpop.eup %2704 }
 0x2da   :  { %451 = vrot.lane.b32.xlu0 %v2705_v8, %s2977_s1 }
 0x34c   :  { %v452_v14 = vpop.permute.xlu0 %451 }
 0x34d   :  { %v454_v16 = vmul.f32 %v452_v14, %v449_v13 }
 0x34f   :  { %v456_v17 = vadd.f32 %v455_v15, %v454_v16 }
 0x351   :  { %v3205_v19 = vmul.f32 %v3201_v18, %v456_v17 }
 0x353   :  { %595 = vrot.lane.b32.xlu1 %v3205_v19, %s2977_s1  ;;  %v695_v51 = vrot.slane %v3205_v19, 4 }
 0x3c5   :  { %v596_v20 = vpop.permute.xlu1 %595 }
 0x3c6   :  { %2522 = vmatmul.mubr.msk.f32.vlgmr.msra.gmra.mxu1 %vm233_vm7, %v596_v20 }
 0x3c7   :  { %2536 = vmatpush3.msra.mxu1 %v3086_v22  ;;  %2543 = vmatprep.mubr.msk.f32.mxu1 %vm2975_vm6, %v2974_v1 }
 0x3c8   :  { %2537 = vmatprep.subr.mxu1 %v2974_v1 }
 0x3c9   :  { %2538 = vmatpush3.msra.mxu1 %v3093_v24 }
 0x3ca   :  { %2539 = vmatprep.subr.mxu1 %v2974_v1 }
 0x3cb   :  { %2540 = vmatpush3.msra.mxu1 %v3102_v26 }
 0x3cc   :  { %2541 = vmatprep.subr.mxu1 %v2974_v1 }
 0x3cd   :  { %2542 = vmatpush3.msra.mxu1 %v3110_v27 }
 0x3ce   :  { %2557 = vmatprep.subr.mxu1 %v2974_v1 }
 0x486   :  { %v665_v28 = vpop.f32.mrf.mxu1 }
 0x487   :  { %v666_v30 = vadd.f32 %v3129_v35, %v665_v28 }
 0x488   :  { %v2523_v31 = vpop.f32.mrf.mxu1 }
 0x489   :  { %v670_v32 = vrot.slane %v666_v30, 4 }
 0x48b   :  { %679 = vrot.lane.b32.xlu0 %v670_v32, %s2976_s12  ;;  %v672_v33 = vadd.f32 %v670_v32, %v3155_v47 }
 0x48d   :  { %v2358_v34 = vmul.f32 -1.442695, %v672_v33 }
 0x48f   :  { %2706 = vpow2.f32 %v2358_v34 }
 0x49c   :  { %v2707_v36 = vpop.eup %2706 }
 0x49d   :  { %v676_v37 = vadd.f32 1.0, %v2707_v36 }
 0x49f   :  { %2708 = vrcp.f32 %v676_v37 }
 0x4ac   :  { %v2709_v38 = vpop.eup %2708 }
 0x4ad   :  { %v689_v49 = vsub.f32 1.0, %v2709_v38  ;;  %v697_v54 = vmul.f32 %v2709_v38, %v695_v51 }
 0x4fd   :  { %v680_v39 = vpop.permute.xlu0 %679 }
 0x4fe   :  { %v682_v41 = vmul.f32 %v2709_v38, %v680_v39 }
 0x500   :  { %684 = vrot.lane.b32.xlu1 %v682_v41, %s2976_s12 }
 0x504   :  { %809 = vperm.xlu1 %2693, %v3176_v5  }
 0x508   :  { %535 = vrot.lane.b32.xlu1 %v534_v44, %s2977_s1 }
 0x509   :  { %2694 = vset.pattern.permute.xlu1 %v2980_v7 }
 0x572   :  { %v685_v45 = vpop.permute.xlu1 %684 }
 0x573   :  { %v687_v46 = vadd.f32 %v685_v45, %v3155_v47  ;;  %v2981_v45 = vmov 2  }
 0x575   :  { %2710 = vtanh.f32 %v687_v46 }
 0x57f   :  { %v3246_v63 = vpop.permute.xlu1 %809 }
 0x582   :  { %v2711_v48 = vpop.eup %2710 }
 0x583   :  { %691 = vrot.lane.b32.xlu0 %v2711_v48, %s2977_s1  ;;  %v536_v0 = vpop.permute.xlu1 %535 }
 0x584   :  { %v538_v2 = vadd.f32 %v536_v0, %v3171_v61  ;;  %v545_v30 = vadd.f32 %v536_v0, %v3256_v21 }
 0x586   :  { %v2355_v3 = vmul.f32 -1.442695, %v538_v2  ;;  %v2356_v31 = vmul.f32 -1.442695, %v545_v30 }
 0x588   :  { %2712 = vpow2.f32 %v2355_v3 }
 0x595   :  { %v2713_v4 = vpop.eup %2712 }
 0x596   :  { %v542_v6 = vadd.f32 1.0, %v2713_v4 }
 0x598   :  { %2714 = vrcp.f32 %v542_v6 }
 0x5a5   :  { %v2715_v14 = vpop.eup %2714 }
 0x5f5   :  { %v692_v52 = vpop.permute.xlu0 %691 }
 0x5f6   :  { %v694_v56 = vmul.f32 %v692_v52, %v689_v49 }
 0x5f8   :  { %v3241_v58 = vadd.f32 %v697_v54, %v694_v56 }
 0x5fa   :  { %v827_v60 = vsub.f32 %v3241_v58, %v695_v51 }
 0x5fc   :  { %v829_v62 = vrot.slane %v827_v60, 4 }
 0x5fe   :  { %830 = vrot.lane.b32.xlu0 %v829_v62, %s2977_s1 }
 0x602   :  { %552 = vrot.lane.b32.xlu0 %v534_v44, %s2979_s16 }
 0x670   :  { %v831_v8 = vpop.permute.xlu0 %830 }
 0x671   :  { %v833_v13 = vmul.f32 %v831_v8, %v3246_v63 }
 0x673   :  { %835 = vrot.lane.b32.xlu1 %v833_v13, %s2979_s16 }
 0x674   :  { %v553_v15 = vpop.permute.xlu0 %552 }
 0x675   :  { %v555_v16 = vmul.f32 %v2715_v14, %v553_v15 }
 0x677   :  { %557 = vrot.lane.b32.xlu0 %v555_v16, %s2976_s12 }
 0x6e5   :  { %v836_v17 = vpop.permute.xlu1 %835 }
 0x6e6   :  { %v3253_v20 = vadd.f32 %v836_v17, %v3205_v19  ;;  %v2982_v17 = vmov 6  }
 0x6e8   :  { %843 = vrot.lane.b32.xlu1 %v3253_v20, %s2977_s1 }
 0x6e9   :  { %v558_v25 = vpop.permute.xlu0 %557 }
 0x6ea   :  { %v560_v28 = vadd.f32 %v558_v25, %v3256_v21 }
 0x6ec   :  { %2716 = vtanh.f32 %v560_v28  ;;  %583 = vperm.xlu1 %2694, %v3176_v5  }
 0x6ed   :  { %2718 = vpow2.f32 %v2356_v31 }
 0x6f0   :  { %2695 = vset.pattern.permute.xlu1 %v2981_v45 }
 0x6f9   :  { %v2717_v29 = vpop.eup %2716 }
 0x6fa   :  { %564 = vrot.lane.b32.xlu0 %v2717_v29, %s2977_s1  ;;  %v2719_v32 = vpop.eup %2718 }
 0x6fb   :  { %v549_v33 = vadd.f32 1.0, %v2719_v32 }
 0x6fd   :  { %2720 = vrcp.f32 %v549_v33 }
 0x70a   :  { %v2721_v23 = vpop.eup %2720 }
 0x70b   :  { %v562_v34 = vsub.f32 1.0, %v2721_v23  ;;  %v568_v37 = vmul.f32 0.0, %v2721_v23 }
 0x75a   :  { %v844_v43 = vpop.permute.xlu1 %843 }
 0x75b   :  { %2544 = vmatmul.mubr.msk.f32.vlgmr.msra.gmra.mxu1 %vm233_vm7, %v844_v43 }
 0x75c   :  { %2558 = vmatpush3.msra.mxu1 %v3086_v22  ;;  %2565 = vmatprep.mubr.msk.f32.mxu1 %vm2975_vm6, %v2974_v1 }
 0x75d   :  { %2559 = vmatprep.subr.mxu1 %v2974_v1 }
 0x75e   :  { %2560 = vmatpush3.msra.mxu1 %v3093_v24 }
 0x75f   :  { %2561 = vmatprep.subr.mxu1 %v2974_v1 }
 0x760   :  { %2562 = vmatpush3.msra.mxu1 %v3102_v26 }
 0x761   :  { %2563 = vmatprep.subr.mxu1 %v2974_v1 }
 0x762   :  { %2564 = vmatpush3.msra.mxu1 %v3110_v27 }
 0x763   :  { %2579 = vmatprep.subr.mxu1 %v2974_v1 }
 0x767   :  { %v3275_v42 = vpop.permute.xlu1 %583 }
 0x76c   :  { %v565_v36 = vpop.permute.xlu0 %564 }
 0x76d   :  { %v567_v38 = vmul.f32 %v565_v36, %v562_v34 }
 0x76f   :  { %v569_v39 = vadd.f32 %v568_v37, %v567_v38 }
 0x771   :  { %v587_v41 = vrot.slane %v569_v39, 4 }
 0x773   :  { %v3278_v44 = vmul.f32 %v587_v41, %v3275_v42 }
 0x775   :  { %591 = vst.msk [vmem:[#allocation9 + $0x1c] sm:$0xf] %vm580_vm9, %v3278_v44  ;;  %2533 = vmatmul.mubr.msk.f32.vlgmr.msra.gmra.mxu0 %vm233_vm7, %v3278_v44 }
 0x776   :  { %2547 = vmatpush3.msra.mxu0 %v3181_v9  ;;  %2554 = vmatprep.mubr.msk.f32.mxu0 %vm2975_vm6, %v2974_v1 }
 0x777   :  { %2548 = vmatprep.subr.mxu0 %v2974_v1 }
 0x778   :  { %2549 = vmatpush3.msra.mxu0 %v3183_v10 }
 0x779   :  { %2550 = vmatprep.subr.mxu0 %v2974_v1 }
 0x77a   :  { %2551 = vmatpush3.msra.mxu0 %v3187_v11 }
 0x77b   :  { %2552 = vmatprep.subr.mxu0 %v2974_v1 }
 0x77c   :  { %2553 = vmatpush3.msra.mxu0 %v3191_v12 }
 0x77d   :  { %2568 = vmatprep.subr.mxu0 %v2974_v1 }
 0x81b   :  { %v913_v46 = vpop.f32.mrf.mxu1 }
 0x81c   :  { %v914_v48 = vadd.f32 %v3129_v35, %v913_v46 }
 0x81d   :  { %v2545_v49 = vpop.f32.mrf.mxu1 }
 0x81e   :  { %925 = vrot.lane.b32.xlu0 %v914_v48, %s2976_s12  ;;  %v917_v56 = vadd.f32 %v914_v48, %v3161_v53 }
 0x820   :  { %v2363_v60 = vmul.f32 -1.442695, %v917_v56 }
 0x822   :  { %2722 = vpow2.f32 %v2363_v60 }
 0x82f   :  { %v2723_v62 = vpop.eup %2722 }
 0x830   :  { %v921_v0 = vadd.f32 1.0, %v2723_v62 }
 0x832   :  { %2724 = vrcp.f32 %v921_v0 }
 0x835   :  { %v768_v51 = vpop.f32.mrf.mxu0 }
 0x836   :  { %v769_v52 = vadd.f32 %v3232_v40, %v768_v51 }
 0x837   :  { %v2534_v54 = vpop.f32.mrf.mxu0 }
 0x838   :  { %773 = vrot.lane.b32.xlu0 %v769_v52, %s2977_s1 }
 0x83f   :  { %v2725_v2 = vpop.eup %2724 }
 0x840   :  { %v935_v31 = vsub.f32 1.0, %v2725_v2  ;;  %v941_v33 = vmul.f32 %v2725_v2, %v3253_v20 }
 0x890   :  { %v926_v3 = vpop.permute.xlu0 %925 }
 0x891   :  { %v928_v4 = vmul.f32 %v2725_v2, %v926_v3 }
 0x893   :  { %930 = vrot.lane.b32.xlu1 %v928_v4, %s2976_s12 }
 0x897   :  { %790 = vrot.lane.b32.xlu1 %v769_v52, %s2979_s16 }
 0x89b   :  { %1056 = vperm.xlu1 %2695, %v3176_v5  }
 0x89f   :  { %2696 = vset.pattern.permute.xlu1 %v2982_v17 }
 0x8aa   :  { %v774_v6 = vpop.permute.xlu0 %773 }
 0x8ab   :  { %v776_v7 = vadd.f32 %v774_v6, %v3171_v61  ;;  %v783_v46 = vadd.f32 %v774_v6, %v3256_v21 }
 0x8ad   :  { %v2360_v8 = vmul.f32 -1.442695, %v776_v7  ;;  %v2361_v48 = vmul.f32 -1.442695, %v783_v46 }
 0x8af   :  { %2726 = vpow2.f32 %v2360_v8 }
 0x8bc   :  { %v2727_v13 = vpop.eup %2726 }
 0x8bd   :  { %v780_v15 = vadd.f32 1.0, %v2727_v13 }
 0x905   :  { %v931_v14 = vpop.permute.xlu1 %930 }
 0x906   :  { %v933_v16 = vadd.f32 %v931_v14, %v3161_v53 }
 0x908   :  { %2728 = vtanh.f32 %v933_v16 }
 0x909   :  { %2730 = vrcp.f32 %v780_v15  ;;  %v791_v28 = vpop.permute.xlu1 %790 }
 0x915   :  { %v2729_v25 = vpop.eup %2728 }
 0x916   :  { %937 = vrot.lane.b32.xlu0 %v2729_v25, %s2977_s1  ;;  %v2731_v29 = vpop.eup %2730  ;;  %v3312_v38 = vpop.permute.xlu1 %1056  ;;  %v2983_v25 = vmov 3  }
 0x917   :  { %v793_v30 = vmul.f32 %v2731_v29, %v791_v28  ;;  %2697 = vset.pattern.permute.xlu0 %v2983_v25 }
 0x91a   :  { %795 = vrot.lane.b32.xlu0 %v793_v30, %s2976_s12 }
 0x988   :  { %v938_v32 = vpop.permute.xlu0 %937 }
 0x989   :  { %v940_v43 = vmul.f32 %v938_v32, %v935_v31 }
 0x98b   :  { %v3307_v23 = vadd.f32 %v941_v33, %v940_v43 }
 0x98c   :  { %v796_v34 = vpop.permute.xlu0 %795 }
 0x98d   :  { %v1076_v36 = vsub.f32 %v3307_v23, %v3253_v20  ;;  %v798_v37 = vadd.f32 %v796_v34, %v3256_v21 }
 0x98f   :  { %2732 = vtanh.f32 %v798_v37  ;;  %v1077_v39 = vmul.f32 %v1076_v36, %v3312_v38 }
 0x990   :  { %2734 = vpow2.f32 %v2361_v48 }
 0x991   :  { %v3316_v41 = vadd.f32 %v1077_v39, %v3253_v20 }
 0x993   :  { %1086 = vrot.lane.b32.xlu1 %v3316_v41, %s2977_s1 }
 0x997   :  { %821 = vperm.xlu1 %2696, %v3176_v5  }
 0x99c   :  { %v2733_v45 = vpop.eup %2732 }
 0x99d   :  { %802 = vrot.lane.b32.xlu0 %v2733_v45, %s2977_s1  ;;  %v2735_v49 = vpop.eup %2734 }
 0x99e   :  { %v787_v51 = vadd.f32 1.0, %v2735_v49 }
 0x9a0   :  { %2736 = vrcp.f32 %v787_v51  ;;  %v2984_v51 = vmov 5  }
 0x9ad   :  { %v2737_v20 = vpop.eup %2736 }
 0x9ae   :  { %v800_v21 = vsub.f32 1.0, %v2737_v20  ;;  %v806_v56 = vmul.f32 %v2737_v20, %v3278_v44 }
 0xa05   :  { %v1087_v52 = vpop.permute.xlu1 %1086 }
 0xa06   :  { %2566 = vmatmul.mubr.msk.f32.vlgmr.msra.gmra.mxu1 %vm233_vm7, %v1087_v52 }
 0xa07   :  { %2580 = vmatpush3.msra.mxu1 %v3086_v22  ;;  %2587 = vmatprep.mubr.msk.f32.mxu1 %vm2975_vm6, %v2974_v1 }
 0xa08   :  { %2581 = vmatprep.subr.mxu1 %v2974_v1 }
 0xa09   :  { %2582 = vmatpush3.msra.mxu1 %v3093_v24 }
 0xa0a   :  { %2583 = vmatprep.subr.mxu1 %v2974_v1 }
 0xa0b   :  { %2584 = vmatpush3.msra.mxu1 %v3102_v26 }
 0xa0c   :  { %2585 = vmatprep.subr.mxu1 %v2974_v1 }
 0xa0d   :  { %2586 = vmatpush3.msra.mxu1 %v3110_v27 }
 0xa0e   :  { %2601 = vmatprep.subr.mxu1 %v2974_v1 }
 0xa0f   :  { %v803_v54 = vpop.permute.xlu0 %802 }
 0xa10   :  { %v805_v60 = vmul.f32 %v803_v54, %v800_v21 }
 0xa12   :  { %v807_v62 = vadd.f32 %v806_v56, %v805_v60  ;;  %v3335_v0 = vpop.permute.xlu1 %821 }
 0xa14   :  { %v839_v2 = vsub.f32 %v807_v62, %v3278_v44  ;;  %v824_v3 = vmul.f32 %v3335_v0, %v807_v62  ;;  %v1186_v62 = vrot.slane %v3316_v41, 4 }
 0xa16   :  { %826 = vst.msk [vmem:[#allocation9 + $0x18] sm:$0xf] %vm580_vm9, %v824_v3  ;;  %v840_v4 = vmul.f32 %v839_v2, %v3335_v0 }
 0xa18   :  { %v3342_v6 = vadd.f32 %v840_v4, %v3278_v44 }
 0xa1a   :  { %2555 = vmatmul.mubr.msk.f32.vlgmr.msra.gmra.mxu0 %vm233_vm7, %v3342_v6 }
 0xa1b   :  { %2569 = vmatpush3.msra.mxu0 %v3181_v9  ;;  %2576 = vmatprep.mubr.msk.f32.mxu0 %vm2975_vm6, %v2974_v1 }
 0xa1c   :  { %2570 = vmatprep.subr.mxu0 %v2974_v1 }
 0xa1d   :  { %2571 = vmatpush3.msra.mxu0 %v3183_v10 }
 0xa1e   :  { %2572 = vmatprep.subr.mxu0 %v2974_v1 }
 0xa1f   :  { %2573 = vmatpush3.msra.mxu0 %v3187_v11 }
 0xa20   :  { %2574 = vmatprep.subr.mxu0 %v2974_v1 }
 0xa21   :  { %2575 = vmatpush3.msra.mxu0 %v3191_v12 }
 0xa22   :  { %2590 = vmatprep.subr.mxu0 %v2974_v1 }
 0xac6   :  { %v1156_v44 = vpop.f32.mrf.mxu1 }
 0xac7   :  { %v1157_v7 = vadd.f32 %v3129_v35, %v1156_v44 }
 0xac8   :  { %v2567_v8 = vpop.f32.mrf.mxu1 }
 0xac9   :  { %v1161_v13 = vrot.slane %v1157_v7, 4 }
 0xacb   :  { %1170 = vrot.lane.b32.xlu0 %v1161_v13, %s2976_s12  ;;  %v1163_v28 = vadd.f32 %v1161_v13, %v3161_v53 }
 0xacd   :  { %v2368_v29 = vmul.f32 -1.442695, %v1163_v28 }
 0xacf   :  { %2738 = vpow2.f32 %v2368_v29 }
 0xada   :  { %v1012_v14 = vpop.f32.mrf.mxu0 }
 0xadb   :  { %v1013_v15 = vadd.f32 %v3232_v40, %v1012_v14 }
 0xadc   :  { %v2556_v16 = vpop.f32.mrf.mxu0  ;;  %v2739_v30 = vpop.eup %2738 }
 0xadd   :  { %v1017_v17 = vrot.slane %v1013_v15, 4  ;;  %v1167_v31 = vadd.f32 1.0, %v2739_v30 }
 0xadf   :  { %1018 = vrot.lane.b32.xlu1 %v1017_v17, %s2977_s1  ;;  %2740 = vrcp.f32 %v1167_v31 }
 0xae3   :  { %1035 = vrot.lane.b32.xlu1 %v1017_v17, %s2979_s16 }
 0xaec   :  { %v2741_v32 = vpop.eup %2740 }
 0xaed   :  { %v1180_v60 = vsub.f32 1.0, %v2741_v32  ;;  %v1188_v3 = vmul.f32 %v2741_v32, %v1186_v62 }
 0xb3d   :  { %v1171_v33 = vpop.permute.xlu0 %1170 }
 0xb3e   :  { %v1173_v43 = vmul.f32 %v2741_v32, %v1171_v33  ;;  %v1051_v32 = vrot.slane %v3342_v6, 4 }
 0xb40   :  { %1175 = vrot.lane.b32.xlu0 %v1173_v43, %s2976_s12 }
 0xb51   :  { %v1019_v34 = vpop.permute.xlu1 %1018 }
 0xb52   :  { %v1021_v36 = vadd.f32 %v1019_v34, %v3166_v57  ;;  %v1028_v14 = vadd.f32 %v1019_v34, %v3169_v59 }
 0xb54   :  { %v2365_v37 = vmul.f32 -1.442695, %v1021_v36  ;;  %v2366_v15 = vmul.f32 -1.442695, %v1028_v14 }
 0xb55   :  { %v1036_v48 = vpop.permute.xlu1 %1035 }
 0xb56   :  { %2742 = vpow2.f32 %v2365_v37 }
 0xb63   :  { %v2743_v39 = vpop.eup %2742 }
 0xb64   :  { %v1025_v45 = vadd.f32 1.0, %v2743_v39 }
 0xb66   :  { %2744 = vrcp.f32 %v1025_v45 }
 0xb73   :  { %v2745_v46 = vpop.eup %2744 }
 0xb74   :  { %v1038_v49 = vmul.f32 %v2745_v46, %v1036_v48 }
 0xb76   :  { %1040 = vrot.lane.b32.xlu0 %v1038_v49, %s2976_s12 }
 0xb7a   :  { %1300 = vperm.xlu0 %2697, %v3176_v5  }
 0xb7e   :  { %2698 = vset.pattern.permute.xlu0 %v2984_v51 }
 0xb7f   :  { %1067 = vperm.xlu0 %2698, %v3176_v5  }
 0xbb2   :  { %v1176_v52 = vpop.permute.xlu0 %1175 }
 0xbb3   :  { %v1178_v20 = vadd.f32 %v1176_v52, %v3161_v53 }
 0xbb5   :  { %2746 = vtanh.f32 %v1178_v20 }
 0xbc2   :  { %v2747_v21 = vpop.eup %2746 }
 0xbc3   :  { %1182 = vrot.lane.b32.xlu1 %v2747_v21, %s2977_s1 }
 0xbe8   :  { %v1041_v54 = vpop.permute.xlu0 %1040 }
 0xbe9   :  { %v1043_v56 = vadd.f32 %v1041_v54, %v3169_v59 }
 0xbeb   :  { %2748 = vtanh.f32 %v1043_v56 }
 0xbec   :  { %2750 = vpow2.f32 %v2366_v15 }
 0xbf5   :  { %v3377_v28 = vpop.permute.xlu0 %1300 }
 0xbf8   :  { %v2749_v13 = vpop.eup %2748 }
 0xbf9   :  { %v2751_v16 = vpop.eup %2750 }
 0xbfa   :  { %v1032_v17 = vadd.f32 1.0, %v2751_v16  ;;  %v3382_v45 = vpop.permute.xlu0 %1067 }
 0xbfc   :  { %2752 = vrcp.f32 %v1032_v17 }
 0xc09   :  { %v2753_v25 = vpop.eup %2752 }
 0xc0a   :  { %v1045_v31 = vsub.f32 1.0, %v2753_v25  ;;  %v1053_v43 = vmul.f32 %v2753_v25, %v1051_v32 }
 0xc35   :  { %v1183_v2 = vpop.permute.xlu1 %1182 }
 0xc36   :  { %v1185_v4 = vmul.f32 %v1183_v2, %v1180_v60 }
 0xc38   :  { %v3371_v44 = vadd.f32 %v1188_v3, %v1185_v4 }
 0xc3a   :  { %v1318_v7 = vsub.f32 %v3371_v44, %v1186_v62 }
 0xc3c   :  { %v1320_v8 = vrot.slane %v1318_v7, 4 }
 0xc3e   :  { %1321 = vrot.lane.b32.xlu1 %v1320_v8, %s2977_s1 }
 0xc42   :  { %1047 = vrot.lane.b32.xlu1 %v2749_v13, %s2977_s1 }
 0xcb0   :  { %v1322_v29 = vpop.permute.xlu1 %1321 }
 0xcb1   :  { %v1324_v30 = vmul.f32 %v1322_v29, %v3377_v28 }
 0xcb3   :  { %1326 = vrot.lane.b32.xlu1 %v1324_v30, %s2979_s16 }
 0xcb4   :  { %v1048_v33 = vpop.permute.xlu1 %1047 }
 0xcb5   :  { %v1050_v36 = vmul.f32 %v1048_v33, %v1045_v31 }
 0xcb7   :  { %v1054_v34 = vadd.f32 %v1053_v43, %v1050_v36 }
 0xcb9   :  { %v1071_v37 = vrot.slane %v1054_v34, 4  ;;  %v1079_v39 = vsub.f32 %v1054_v34, %v1051_v32 }
 0xcbb   :  { %v1073_v46 = vmul.f32 %v1071_v37, %v3382_v45  ;;  %v1081_v48 = vrot.slane %v1079_v39, 4 }
 0xcbd   :  { %1075 = vst.msk [vmem:[#allocation9 + $0x14] sm:$0xf] %vm580_vm9, %v1073_v46  ;;  %v1083_v49 = vmul.f32 %v1081_v48, %v3382_v45 }
 0xcbf   :  { %v3388_v51 = vadd.f32 %v1083_v49, %v3342_v6 }
 0xcc1   :  { %2577 = vmatmul.mubr.msk.f32.vlgmr.msra.gmra.mxu0 %vm233_vm7, %v3388_v51 }
 0xcc2   :  { %2591 = vmatpush3.msra.mxu0 %v3181_v9  ;;  %2598 = vmatprep.mubr.msk.f32.mxu0 %vm2975_vm6, %v2974_v1 }
 0xcc3   :  { %2592 = vmatprep.subr.mxu0 %v2974_v1 }
 0xcc4   :  { %2593 = vmatpush3.msra.mxu0 %v3183_v10 }
 0xcc5   :  { %2594 = vmatprep.subr.mxu0 %v2974_v1 }
 0xcc6   :  { %2595 = vmatpush3.msra.mxu0 %v3187_v11 }
 0xcc7   :  { %2596 = vmatprep.subr.mxu0 %v2974_v1 }
 0xcc8   :  { %2597 = vmatpush3.msra.mxu0 %v3191_v12 }
 0xcc9   :  { %2612 = vmatprep.subr.mxu0 %v2974_v1 }
 0xd25   :  { %v1327_v6 = vpop.permute.xlu1 %1326 }
 0xd26   :  { %v3403_v52 = vadd.f32 %v1327_v6, %v3316_v41 }
 0xd28   :  { %1334 = vrot.lane.b32.xlu1 %v3403_v52, %s2977_s1 }
 0xd81   :  { %v1259_v20 = vpop.f32.mrf.mxu0 }
 0xd82   :  { %v1260_v21 = vadd.f32 %v3232_v40, %v1259_v20 }
 0xd83   :  { %v2578_v54 = vpop.f32.mrf.mxu0 }
 0xd84   :  { %1281 = vrot.lane.b32.xlu1 %v1260_v21, %s2979_s16  ;;  %1264 = vrot.lane.b32.xlu0 %v1260_v21, %s2977_s1 }
 0xd9a   :  { %v1335_v56 = vpop.permute.xlu1 %1334 }
 0xd9b   :  { %2588 = vmatmul.mubr.msk.f32.vlgmr.msra.gmra.mxu1 %vm233_vm7, %v1335_v56 }
 0xd9c   :  { %2602 = vmatpush3.msra.mxu1 %v3086_v22  ;;  %2609 = vmatprep.mubr.msk.f32.mxu1 %vm2975_vm6, %v2974_v1 }
 0xd9d   :  { %2603 = vmatprep.subr.mxu1 %v2974_v1 }
 0xd9e   :  { %2604 = vmatpush3.msra.mxu1 %v3093_v24 }
 0xd9f   :  { %2605 = vmatprep.subr.mxu1 %v2974_v1 }
 0xda0   :  { %2606 = vmatpush3.msra.mxu1 %v3102_v26  ;;  %v2985_v26 = vmov 4  }
 0xda1   :  { %2607 = vmatprep.subr.mxu1 %v2974_v1  ;;  %2699 = vset.pattern.permute.xlu0 %v2985_v26 }
 0xda2   :  { %2608 = vmatpush3.msra.mxu1 %v3110_v27 }
 0xda3   :  { %2623 = vmatprep.subr.mxu1 %v2974_v1 }
 0xdf6   :  { %v1265_v41 = vpop.permute.xlu0 %1264  ;;  %v1282_v24 = vpop.permute.xlu1 %1281 }
 0xdf7   :  { %v1267_v22 = vadd.f32 %v1265_v41, %v3166_v57  ;;  %v1274_v32 = vadd.f32 %v1265_v41, %v3169_v59 }
 0xdf9   :  { %v2370_v60 = vmul.f32 -1.442695, %v1267_v22  ;;  %v2371_v33 = vmul.f32 -1.442695, %v1274_v32 }
 0xdfb   :  { %2754 = vpow2.f32 %v2370_v60 }
 0xe08   :  { %v2755_v62 = vpop.eup %2754 }
 0xe09   :  { %v1271_v2 = vadd.f32 1.0, %v2755_v62 }
 0xe0b   :  { %2756 = vrcp.f32 %v1271_v2 }
 0xe18   :  { %v2757_v3 = vpop.eup %2756 }
 0xe19   :  { %v1284_v4 = vmul.f32 %v2757_v3, %v1282_v24 }
 0xe1b   :  { %1286 = vrot.lane.b32.xlu0 %v1284_v4, %s2976_s12 }
 0xe5b   :  { %v1404_v7 = vpop.f32.mrf.mxu1 }
 0xe5c   :  { %v1405_v27 = vadd.f32 %v3129_v35, %v1404_v7 }
 0xe5d   :  { %v2589_v8 = vpop.f32.mrf.mxu1 }
 0xe5e   :  { %1416 = vrot.lane.b32.xlu1 %v1405_v27, %s2976_s12  ;;  %v1408_v16 = vadd.f32 %v1405_v27, %v3166_v57 }
 0xe60   :  { %v2373_v17 = vmul.f32 -1.442695, %v1408_v16  ;;  %v3496_v16 = vld [vmem:[%s3701_s5] sm:$0xff] }
 0xe8d   :  { %v1287_v13 = vpop.permute.xlu0 %1286 }
 0xe8e   :  { %v1289_v14 = vadd.f32 %v1287_v13, %v3169_v59 }
 0xe90   :  { %2758 = vtanh.f32 %v1289_v14  ;;  %v3482_v14 = vld [vmem:[%s3701_s5 + $0x10] sm:$0xff] }
 0xe91   :  { %2760 = vpow2.f32 %v2373_v17 }
 0xe9d   :  { %v2759_v15 = vpop.eup %2758 }
 0xe9e   :  { %1293 = vrot.lane.b32.xlu1 %v2759_v15, %s2977_s1  ;;  %v2761_v25 = vpop.eup %2760  ;;  %v3489_v15 = vld [vmem:[%s3701_s5 + $0x8] sm:$0xff] }
 0xe9f   :  { %v1412_v29 = vadd.f32 1.0, %v2761_v25 }
 0xea1   :  { %2762 = vrcp.f32 %v1412_v29 }
 0xea2   :  { %2764 = vpow2.f32 %v2371_v33 }
 0xeae   :  { %v2763_v30 = vpop.eup %2762 }
 0xeaf   :  { %v2765_v43 = vpop.eup %2764  ;;  %v1432_v60 = vmul.f32 %v2763_v30, %v3403_v52 }
 0xeb0   :  { %v1278_v36 = vadd.f32 1.0, %v2765_v43 }
 0xeb2   :  { %2766 = vrcp.f32 %v1278_v36  ;;  %v3505_v36 = vld [vmem:[%s3702_s6] ss:$0 sm:$0xff] }
 0xebf   :  { %v2767_v34 = vpop.eup %2766 }
 0xec0   :  { %v1291_v48 = vsub.f32 1.0, %v2767_v34  ;;  %v1297_v6 = vmul.f32 %v2767_v34, %v3388_v51 }
 0xed0   :  { %v1417_v31 = vpop.permute.xlu1 %1416 }
 0xed1   :  { %v1419_v35 = vmul.f32 %v2763_v30, %v1417_v31 }
 0xed3   :  { %1421 = vrot.lane.b32.xlu0 %v1419_v35, %s2976_s12 }
 0xed7   :  { %1312 = vperm.xlu0 %2699, %v3176_v5  }
 0xf10   :  { %v1294_v39 = vpop.permute.xlu1 %1293 }
 0xf11   :  { %v1296_v49 = vmul.f32 %v1294_v39, %v1291_v48 }
 0xf13   :  { %v1298_v20 = vadd.f32 %v1297_v6, %v1296_v49 }
 0xf15   :  { %v1330_v5 = vsub.f32 %v1298_v20, %v3388_v51 }
 0xf45   :  { %v1422_v37 = vpop.permute.xlu0 %1421 }
 0xf46   :  { %v1424_v46 = vadd.f32 %v1422_v37, %v3166_v57 }
 0xf48   :  { %2768 = vtanh.f32 %v1424_v46 }
 0xf52   :  { %v3434_v21 = vpop.permute.xlu0 %1312 }
 0xf53   :  { %v1315_v59 = vmul.f32 %v3434_v21, %v1298_v20  ;;  %v1331_v54 = vmul.f32 %v1330_v5, %v3434_v21 }
 0xf55   :  { %v2769_v56 = vpop.eup %2768  ;;  %1317 = vst.msk [vmem:[#allocation9 + $0x10] sm:$0xf] %vm580_vm9, %v1315_v59  ;;  %v3440_v41 = vadd.f32 %v1331_v54, %v3388_v51  ;;  %v1426_v51 = vsub.f32 1.0, %v2763_v30 }
 0xf56   :  { %1428 = vrot.lane.b32.xlu1 %v2769_v56, %s2977_s1 }
 0xf57   :  { %2599 = vmatmul.mubr.msk.f32.vlgmr.msra.gmra.mxu0 %vm233_vm7, %v3440_v41 }
 0xf58   :  { %2613 = vmatpush3.msra.mxu0 %v3181_v9  ;;  %2620 = vmatprep.mubr.msk.f32.mxu0 %vm2975_vm6, %v2974_v1 }
 0xf59   :  { %2614 = vmatprep.subr.mxu0 %v2974_v1 }
 0xf5a   :  { %2615 = vmatpush3.msra.mxu0 %v3183_v10 }
 0xf5b   :  { %2616 = vmatprep.subr.mxu0 %v2974_v1 }
 0xf5c   :  { %2617 = vmatpush3.msra.mxu0 %v3187_v11 }
 0xf5d   :  { %2618 = vmatprep.subr.mxu0 %v2974_v1 }
 0xf5e   :  { %2619 = vmatpush3.msra.mxu0 %v3191_v12 }
 0xf5f   :  { %2634 = vmatprep.subr.mxu0 %v2974_v1 }
 0xfc8   :  { %v1429_v22 = vpop.permute.xlu1 %1428 }
 0xfc9   :  { %v1431_v62 = vmul.f32 %v1429_v22, %v1426_v51 }
 0xfcb   :  { %v3456_v2 = vadd.f32 %v1432_v60, %v1431_v62 }
 0xfcd   :  { %v1559_v3 = vsub.f32 %v3456_v2, %v3403_v52 }
 0xfcf   :  { %v1560_v24 = vmul.f32 %v1559_v3, %v3434_v21 }
 0xfd1   :  { %v3462_v4 = vadd.f32 %v1560_v24, %v3403_v52  ;;  %v3473_v52 = vld [vmem:[%s3701_s5 + $0x18] sm:$0xff] }
 0xfd3   :  { %1569 = vrot.lane.b32.xlu1 %v3462_v4, %s2977_s1 }
0x1017   :  { %v1503_v26 = vpop.f32.mrf.mxu0 }
0x1018   :  { %v1504_v7 = vadd.f32 %v3232_v40, %v1503_v26 }
0x1019   :  { %v2600_v27 = vpop.f32.mrf.mxu0 }
0x101a   :  { %v1508_v8 = vrot.slane %v1504_v7, 4  ;;  %v1542_v7 = vrot.slane %v3440_v41, 4 }
0x101c   :  { %1526 = vrot.lane.b32.xlu1 %v1508_v8, %s2979_s16  ;;  %1509 = vrot.lane.b32.xlu0 %v1508_v8, %s2977_s1 }
0x1045   :  { %v1570_v13 = vpop.permute.xlu1 %1569 }
0x1046   :  { %2610 = vmatmul.mubr.msk.f32.vlgmr.msra.gmra.mxu1 %vm233_vm7, %v1570_v13 }
0x1047   :  { %2624 = vmatpush3.msra.mxu1 %v3473_v52  ;;  %2631 = vmatprep.mubr.msk.f32.mxu1 %vm2975_vm6, %v2974_v1 }
0x1048   :  { %2625 = vmatprep.subr.mxu1 %v2974_v1 }
0x1049   :  { %2626 = vmatpush3.msra.mxu1 %v3482_v14 }
0x104a   :  { %2627 = vmatprep.subr.mxu1 %v2974_v1 }
0x104b   :  { %2628 = vmatpush3.msra.mxu1 %v3489_v15 }
0x104c   :  { %2629 = vmatprep.subr.mxu1 %v2974_v1 }
0x104d   :  { %2630 = vmatpush3.msra.mxu1 %v3496_v16 }
0x104e   :  { %2645 = vmatprep.subr.mxu1 %v2974_v1 }
0x108e   :  { %v1510_v17 = vpop.permute.xlu0 %1509  ;;  %v1527_v32 = vpop.permute.xlu1 %1526 }
0x108f   :  { %v1512_v25 = vadd.f32 %v1510_v17, %v3161_v53  ;;  %v1519_v54 = vadd.f32 %v1510_v17, %v3164_v55 }
0x1091   :  { %v2375_v29 = vmul.f32 -1.442695, %v1512_v25  ;;  %v2376_v60 = vmul.f32 -1.442695, %v1519_v54 }
0x1093   :  { %2770 = vpow2.f32 %v2375_v29 }
0x10a0   :  { %v2771_v30 = vpop.eup %2770 }
0x10a1   :  { %v1516_v31 = vadd.f32 1.0, %v2771_v30 }
0x10a3   :  { %2772 = vrcp.f32 %v1516_v31 }
0x10b0   :  { %v2773_v35 = vpop.eup %2772 }
0x10b1   :  { %v1529_v33 = vmul.f32 %v2773_v35, %v1527_v32 }
0x10b3   :  { %1531 = vrot.lane.b32.xlu0 %v1529_v33, %s2976_s12 }
0x1106   :  { %v1639_v43 = vpop.f32.mrf.mxu1 }
0x1107   :  { %v1640_v34 = vadd.f32 %v3505_v36, %v1639_v43 }
0x1108   :  { %v2611_v37 = vpop.f32.mrf.mxu1 }
0x1109   :  { %v1644_v39 = vrot.slane %v1640_v34, 4 }
0x110b   :  { %1653 = vrot.lane.b32.xlu1 %v1644_v39, %s2976_s12  ;;  %v1646_v6 = vadd.f32 %v1644_v39, %v3166_v57 }
0x110d   :  { %v2378_v20 = vmul.f32 -1.442695, %v1646_v6 }
0x1125   :  { %v1532_v46 = vpop.permute.xlu0 %1531 }
0x1126   :  { %v1534_v48 = vadd.f32 %v1532_v46, %v3164_v55 }
0x1128   :  { %2774 = vtanh.f32 %v1534_v48 }
0x1129   :  { %2776 = vpow2.f32 %v2378_v20 }
0x1135   :  { %v2775_v49 = vpop.eup %2774 }
0x1136   :  { %1538 = vrot.lane.b32.xlu0 %v2775_v49, %s2977_s1  ;;  %v2777_v5 = vpop.eup %2776 }
0x1137   :  { %v1650_v59 = vadd.f32 1.0, %v2777_v5 }
0x1139   :  { %2778 = vrcp.f32 %v1650_v59 }
0x113a   :  { %2780 = vpow2.f32 %v2376_v60 }
0x1146   :  { %v2779_v56 = vpop.eup %2778 }
0x1147   :  { %v2781_v62 = vpop.eup %2780  ;;  %v1663_v43 = vsub.f32 1.0, %v2779_v56 }
0x1148   :  { %v1523_v3 = vadd.f32 1.0, %v2781_v62 }
0x114a   :  { %2782 = vrcp.f32 %v1523_v3 }
0x1157   :  { %v2783_v24 = vpop.eup %2782 }
0x1158   :  { %v1536_v26 = vsub.f32 1.0, %v2783_v24  ;;  %v1544_v8 = vmul.f32 %v2783_v24, %v1542_v7 }
0x117d   :  { %v1654_v51 = vpop.permute.xlu1 %1653 }
0x117e   :  { %v1656_v22 = vmul.f32 %v2779_v56, %v1654_v51 }
0x1180   :  { %1658 = vrot.lane.b32.xlu1 %v1656_v22, %s2976_s12 }
0x11a8   :  { %v1539_v27 = vpop.permute.xlu0 %1538 }
0x11a9   :  { %v1541_v13 = vmul.f32 %v1539_v27, %v1536_v26 }
0x11ab   :  { %v1545_v25 = vadd.f32 %v1544_v8, %v1541_v13 }
0x11ad   :  { %v1554_v29 = vrot.slane %v1545_v25, 4  ;;  %v1562_v17 = vsub.f32 %v1545_v25, %v1542_v7 }
0x11af   :  { %v1556_v30 = vmul.f32 %v1554_v29, %v3377_v28  ;;  %v1564_v31 = vrot.slane %v1562_v17, 4 }
0x11b1   :  { %1558 = vst.msk [vmem:[#allocation9 + $0xc] sm:$0xf] %vm580_vm9, %v1556_v30  ;;  %v1566_v35 = vmul.f32 %v1564_v31, %v3377_v28 }
0x11b3   :  { %v3519_v32 = vadd.f32 %v1566_v35, %v3440_v41  ;;  %v2833_v35 = vld [vmem:[#allocation7 + $0x18] sm:$0xff] }
0x11b5   :  { %2621 = vmatmul.mubr.msk.f32.vlgmr.msra.gmra.mxu0 %vm233_vm7, %v3519_v32 }
0x11b6   :  { %2635 = vmatpush3.msra.mxu0 %v3181_v9  ;;  %2642 = vmatprep.mubr.msk.f32.mxu0 %vm2975_vm6, %v2974_v1 }
0x11b7   :  { %2636 = vmatprep.subr.mxu0 %v2974_v1 }
0x11b8   :  { %2637 = vmatpush3.msra.mxu0 %v3183_v10  ;;  %v1669_v10 = vrot.slane %v3462_v4, 4 }
0x11b9   :  { %2638 = vmatprep.subr.mxu0 %v2974_v1 }
0x11ba   :  { %2639 = vmatpush3.msra.mxu0 %v3187_v11  ;;  %v1671_v39 = vmul.f32 %v2779_v56, %v1669_v10 }
0x11bb   :  { %2640 = vmatprep.subr.mxu0 %v2974_v1 }
0x11bc   :  { %2641 = vmatpush3.msra.mxu0 %v3191_v12 }
0x11bd   :  { %2656 = vmatprep.subr.mxu0 %v2974_v1 }
0x11f2   :  { %v1659_v41 = vpop.permute.xlu1 %1658 }
0x11f3   :  { %v1661_v9 = vadd.f32 %v1659_v41, %v3166_v57  ;;  %v2834_v41 = vld [vmem:[#allocation7 + $0x10] sm:$0xff] }
0x11f5   :  { %2784 = vtanh.f32 %v1661_v9  ;;  %v2835_v9 = vld [vmem:[#allocation7 + $0x8] sm:$0xff] }
0x1202   :  { %v2785_v33 = vpop.eup %2784 }
0x1203   :  { %1665 = vrot.lane.b32.xlu0 %v2785_v33, %s2977_s1 }
0x1275   :  { %v1666_v34 = vpop.permute.xlu0 %1665  ;;  %v1742_v37 = vpop.f32.mrf.mxu0 }
0x1276   :  { %v1668_v11 = vmul.f32 %v1666_v34, %v1663_v43  ;;  %v1743_v57 = vadd.f32 %v3232_v40, %v1742_v37 }
0x1277   :  { %v2622_v46 = vpop.f32.mrf.mxu0 }
0x1278   :  { %v3536_v48 = vadd.f32 %v1671_v39, %v1668_v11 }
0x127a   :  { %v1793_v12 = vsub.f32 %v3536_v48, %v1669_v10 }
0x127c   :  { %v1795_v49 = vrot.slane %v1793_v12, 4 }
0x127e   :  { %1796 = vrot.lane.b32.xlu1 %v1795_v49, %s2977_s1 }
0x1282   :  { %1747 = vrot.lane.b32.xlu1 %v1743_v57, %s2977_s1 }
0x1286   :  { %1764 = vrot.lane.b32.xlu1 %v1743_v57, %s2979_s16  ;;  %v3587_v57 = vld [vmem:[%s3704_s8] ss:$0 sm:$0xff]  ;;  %s2986_s8 = smov [#allocation9]  }
0x1287   :  { %s2306_s25 = sshll.u32 %s2986_s8, 4  ;;  %s2307_s25 = int_to_ptr.vmem [resolvable:$true] %s2306_s25 }
0x1288   :  { %s2898_s26 = scalar_lea.vmem %s2307_s25, 512  ;;  %p2903_p2 = scmp.lt.s32.totalorder %s2307_s25, %s2307_s25 }
0x1289   :  { %p2899_p1 = scmp.ne.s32.totalorder %s2307_s25, %s2898_s26  ;;  %p2904_p3 = scmp.lt.s32.totalorder %s2898_s26, %s2898_s26 }
0x128b   :  { %p2905_p4 = por %p2904_p3, %p2903_p2 }
0x128d   :  { %p2906_p5 = pnand %p2905_p4, %p2899_p1 }
0x12f0   :  { %v1797_v6 = vpop.permute.xlu1 %1796 }
0x12f1   :  { %v1799_v20 = vmul.f32 %v1797_v6, %v3382_v45 }
0x12f3   :  { %1801 = vrot.lane.b32.xlu0 %v1799_v20, %s2979_s16 }
0x12f4   :  { %v1748_v5 = vpop.permute.xlu1 %1747 }
0x12f5   :  { %v1750_v59 = vadd.f32 %v1748_v5, %v3161_v53  ;;  %v1757_v26 = vadd.f32 %v1748_v5, %v3164_v55 }
0x12f7   :  { %v2380_v54 = vmul.f32 -1.442695, %v1750_v59  ;;  %v2381_v7 = vmul.f32 -1.442695, %v1757_v26 }
0x12f8   :  { %v1765_v62 = vpop.permute.xlu1 %1764 }
0x12f9   :  { %2786 = vpow2.f32 %v2380_v54 }
0x1306   :  { %v2787_v56 = vpop.eup %2786 }
0x1307   :  { %v1754_v51 = vadd.f32 1.0, %v2787_v56 }
0x1309   :  { %2788 = vrcp.f32 %v1754_v51 }
0x1316   :  { %v2789_v60 = vpop.eup %2788 }
0x1317   :  { %v1767_v3 = vmul.f32 %v2789_v60, %v1765_v62 }
0x1365   :  { %v1802_v22 = vpop.permute.xlu0 %1801 }
0x1366   :  { %v3547_v40 = vadd.f32 %v1802_v22, %v3462_v4 }
0x1368   :  { %1809 = vrot.lane.b32.xlu0 %v3547_v40, %s2977_s1 }
0x136c   :  { %1769 = vrot.lane.b32.xlu0 %v1767_v3, %s2976_s12 }
0x13da   :  { %v1810_v24 = vpop.permute.xlu0 %1809 }
0x13db   :  { %2632 = vmatmul.mubr.msk.f32.vlgmr.msra.gmra.mxu1 %vm233_vm7, %v1810_v24 }
0x13dc   :  { %2646 = vmatpush3.msra.mxu1 %v3473_v52  ;;  %2653 = vmatprep.mubr.msk.f32.mxu1 %vm2975_vm6, %v2974_v1 }
0x13dd   :  { %2647 = vmatprep.subr.mxu1 %v2974_v1 }
0x13de   :  { %v1770_v53 = vpop.permute.xlu0 %1769  ;;  %2648 = vmatpush3.msra.mxu1 %v3482_v14 }
0x13df   :  { %v1772_v4 = vadd.f32 %v1770_v53, %v3164_v55  ;;  %2649 = vmatprep.subr.mxu1 %v2974_v1 }
0x13e0   :  { %2650 = vmatpush3.msra.mxu1 %v3489_v15 }
0x13e1   :  { %2790 = vtanh.f32 %v1772_v4  ;;  %2651 = vmatprep.subr.mxu1 %v2974_v1 }
0x13e2   :  { %2652 = vmatpush3.msra.mxu1 %v3496_v16  ;;  %2792 = vpow2.f32 %v2381_v7 }
0x13ee   :  { %v2791_v52 = vpop.eup %2790 }
0x13ef   :  { %1776 = vrot.lane.b32.xlu1 %v2791_v52, %s2977_s1  ;;  %v2793_v27 = vpop.eup %2792 }
0x13f0   :  { %v1761_v14 = vadd.f32 1.0, %v2793_v27 }
0x13f2   :  { %2794 = vrcp.f32 %v1761_v14 }
0x13ff   :  { %v2795_v8 = vpop.eup %2794 }
0x1400   :  { %v1774_v13 = vsub.f32 1.0, %v2795_v8  ;;  %v1780_v15 = vmul.f32 %v2795_v8, %v3519_v32 }
0x1461   :  { %v1777_v25 = vpop.permute.xlu1 %1776 }
0x1462   :  { %v1779_v29 = vmul.f32 %v1777_v25, %v1774_v13 }
0x1464   :  { %v1781_v17 = vadd.f32 %v1780_v15, %v1779_v29 }
0x1466   :  { %v1790_v30 = vmul.f32 %v1781_v17, %v3312_v38  ;;  %v1805_v16 = vsub.f32 %v1781_v17, %v3519_v32 }
0x1468   :  { %1792 = vst.msk [vmem:[#allocation9 + $0x8] sm:$0xf] %vm580_vm9, %v1790_v30  ;;  %v1806_v55 = vmul.f32 %v1805_v16, %v3312_v38 }
0x146a   :  { %v3571_v31 = vadd.f32 %v1806_v55, %v3519_v32  ;;  %v2836_v32 = vld [vmem:[#allocation7] sm:$0xff] }
0x146c   :  { %2643 = vmatmul.mubr.msk.f32.vlgmr.msra.gmra.mxu0 %vm233_vm7, %v3571_v31 }
0x146d   :  { %2657 = vmatpush3.msra.mxu0 %v2833_v35  ;;  %2664 = vmatprep.mubr.msk.f32.mxu0 %vm2975_vm6, %v2974_v1 }
0x146e   :  { %2658 = vmatprep.subr.mxu0 %v2974_v1 }
0x146f   :  { %2659 = vmatpush3.msra.mxu0 %v2834_v41 }
0x1470   :  { %2660 = vmatprep.subr.mxu0 %v2974_v1 }
0x1471   :  { %2661 = vmatpush3.msra.mxu0 %v2835_v9 }
0x1472   :  { %2662 = vmatprep.subr.mxu0 %v2974_v1 }
0x1473   :  { %2663 = vmatpush3.msra.mxu0 %v2836_v32  ;;  %v2017_v32 = vrot.slane %v3571_v31, 4 }
0x149b   :  { %v1879_v33 = vpop.f32.mrf.mxu1 }
0x149c   :  { %v1880_v43 = vadd.f32 %v3505_v36, %v1879_v33 }
0x149d   :  { %v2633_v10 = vpop.f32.mrf.mxu1 }
0x149e   :  { %1891 = vrot.lane.b32.xlu0 %v1880_v43, %s2976_s12  ;;  %v1883_v34 = vadd.f32 %v1880_v43, %v3171_v61 }
0x14a0   :  { %v2383_v37 = vmul.f32 -1.442695, %v1883_v34 }
0x14a2   :  { %2796 = vpow2.f32 %v2383_v37 }
0x14af   :  { %v2797_v39 = vpop.eup %2796 }
0x14b0   :  { %v1887_v11 = vadd.f32 1.0, %v2797_v39 }
0x14b2   :  { %2798 = vrcp.f32 %v1887_v11 }
0x14bf   :  { %v2799_v46 = vpop.eup %2798 }
0x14c0   :  { %v1901_v24 = vsub.f32 1.0, %v2799_v46  ;;  %v1907_v4 = vmul.f32 %v2799_v46, %v3547_v40 }
0x1510   :  { %v1892_v12 = vpop.permute.xlu0 %1891 }
0x1511   :  { %v1894_v49 = vmul.f32 %v2799_v46, %v1892_v12 }
0x1513   :  { %1896 = vrot.lane.b32.xlu1 %v1894_v49, %s2976_s12 }
0x152c   :  { %v1978_v1 = vpop.f32.mrf.mxu0 }
0x152d   :  { %v1979_v6 = vadd.f32 %v3587_v57, %v1978_v1 }
0x152e   :  { %v2644_v20 = vpop.f32.mrf.mxu0 }
0x152f   :  { %v1983_v5 = vrot.slane %v1979_v6, 4 }
0x1531   :  { %1984 = vrot.lane.b32.xlu1 %v1983_v5, %s2977_s1 }
0x1585   :  { %v1897_v59 = vpop.permute.xlu1 %1896 }
0x1586   :  { %v1899_v54 = vadd.f32 %v1897_v59, %v3171_v61 }
0x1588   :  { %2800 = vtanh.f32 %v1899_v54 }
0x1595   :  { %v2801_v56 = vpop.eup %2800 }
0x1596   :  { %1903 = vrot.lane.b32.xlu0 %v2801_v56, %s2977_s1 }
0x159a   :  { %2001 = vrot.lane.b32.xlu0 %v1983_v5, %s2979_s16 }
0x15a3   :  { %v1985_v51 = vpop.permute.xlu1 %1984 }
0x15a4   :  { %v1987_v22 = vadd.f32 %v1985_v51, %v3155_v47  ;;  %v1994_v16 = vadd.f32 %v1985_v51, %v3159_v50 }
0x15a6   :  { %v2385_v60 = vmul.f32 -1.442695, %v1987_v22  ;;  %v2386_v55 = vmul.f32 -1.442695, %v1994_v16 }
0x15a8   :  { %2802 = vpow2.f32 %v2385_v60 }
0x15b5   :  { %v2803_v62 = vpop.eup %2802 }
0x15b6   :  { %v1991_v3 = vadd.f32 1.0, %v2803_v62 }
0x15b8   :  { %2804 = vrcp.f32 %v1991_v3 }
0x15c5   :  { %v2805_v7 = vpop.eup %2804 }
0x1608   :  { %v1904_v53 = vpop.permute.xlu0 %1903 }
0x1609   :  { %v1906_v52 = vmul.f32 %v1904_v53, %v1901_v24 }
0x160b   :  { %v3596_v26 = vadd.f32 %v1907_v4, %v1906_v52 }
0x160c   :  { %v2002_v27 = vpop.permute.xlu0 %2001 }
0x160d   :  { %v2034_v14 = vsub.f32 %v3596_v26, %v3547_v40  ;;  %v2004_v8 = vmul.f32 %v2805_v7, %v2002_v27 }
0x160f   :  { %2006 = vrot.lane.b32.xlu0 %v2004_v8, %s2976_s12  ;;  %v2035_v13 = vmul.f32 %v2034_v14, %v3335_v0 }
0x1611   :  { %v3603_v25 = vadd.f32 %v2035_v13, %v3547_v40 }
0x1613   :  { %2044 = vrot.lane.b32.xlu1 %v3603_v25, %s2977_s1  ;;  %v2144_v13 = vrot.slane %v3603_v25, 4 }
0x1681   :  { %v2007_v15 = vpop.permute.xlu0 %2006 }
0x1682   :  { %v2009_v29 = vadd.f32 %v2007_v15, %v3159_v50 }
0x1684   :  { %2806 = vtanh.f32 %v2009_v29 }
0x1685   :  { %v2045_v17 = vpop.permute.xlu1 %2044  ;;  %2808 = vpow2.f32 %v2386_v55 }
0x1686   :  { %2654 = vmatmul.mubr.msk.f32.vlgmr.msra.gmra.mxu1 %vm233_vm7, %v2045_v17 }
0x1691   :  { %v2807_v30 = vpop.eup %2806 }
0x1692   :  { %2013 = vrot.lane.b32.xlu1 %v2807_v30, %s2977_s1  ;;  %v2809_v35 = vpop.eup %2808 }
0x1693   :  { %v1998_v40 = vadd.f32 1.0, %v2809_v35 }
0x1695   :  { %2810 = vrcp.f32 %v1998_v40 }
0x16a2   :  { %v2811_v41 = vpop.eup %2810 }
0x16a3   :  { %v2011_v9 = vsub.f32 1.0, %v2811_v41  ;;  %v2019_v43 = vmul.f32 %v2811_v41, %v2017_v32 }
0x1704   :  { %v2014_v33 = vpop.permute.xlu1 %2013 }
0x1705   :  { %v2016_v10 = vmul.f32 %v2014_v33, %v2011_v9  ;;  %v813_v33 = vrot.slane %v3241_v58, 4 }
0x1707   :  { %v2020_v34 = vadd.f32 %v2019_v43, %v2016_v10  ;;  %v1783_v43 = vrot.slane %v3536_v48, 4  ;;  %v1059_v48 = vmul.f32 %v3312_v38, %v3307_v23 }
0x1709   :  { %v2029_v37 = vrot.slane %v2020_v34, 4  ;;  %v2037_v39 = vsub.f32 %v2020_v34, %v2017_v32  ;;  %v1304_v34 = vrot.slane %v3371_v44, 4 }
0x170b   :  { %v2031_v11 = vmul.f32 %v2029_v37, %v3246_v63  ;;  %v2039_v46 = vrot.slane %v2037_v39, 4  ;;  %v1546_v37 = vmul.f32 %v3456_v2, %v3434_v21 }
0x170d   :  { %2033 = vst.msk [vmem:[#allocation9 + $0x4] sm:$0xf] %vm580_vm9, %v2031_v11  ;;  %v2041_v12 = vmul.f32 %v2039_v46, %v3246_v63 }
0x170f   :  { %v3616_v49 = vadd.f32 %v2041_v12, %v3571_v31 }
0x1711   :  { %2665 = vmatmul.mubr.msk.f32.vlgmr.msra.gmra.mxu0 %vm233_vm7, %v3616_v49 }
0x1746   :  { %v2114_v1 = vpop.f32.mrf.mxu1 }
0x1747   :  { %v2115_v6 = vadd.f32 %v3505_v36, %v2114_v1 }
0x1748   :  { %v2655_v20 = vpop.f32.mrf.mxu1 }
0x1749   :  { %v2119_v5 = vrot.slane %v2115_v6, 4 }
0x174b   :  { %2128 = vrot.lane.b32.xlu0 %v2119_v5, %s2976_s12  ;;  %v2121_v59 = vadd.f32 %v2119_v5, %v3171_v61 }
0x174d   :  { %v2388_v54 = vmul.f32 -1.442695, %v2121_v59 }
0x174f   :  { %2812 = vpow2.f32 %v2388_v54 }
0x175c   :  { %v2813_v56 = vpop.eup %2812 }
0x175d   :  { %v2125_v51 = vadd.f32 1.0, %v2813_v56 }
0x175f   :  { %2814 = vrcp.f32 %v2125_v51 }
0x176c   :  { %v2815_v22 = vpop.eup %2814 }
0x176d   :  { %v2146_v29 = vmul.f32 %v2815_v22, %v2144_v13 }
0x17bd   :  { %v2129_v31 = vpop.permute.xlu0 %2128 }
0x17be   :  { %v2131_v60 = vmul.f32 %v2815_v22, %v2129_v31 }
0x17c0   :  { %2133 = vrot.lane.b32.xlu1 %v2131_v60, %s2976_s12 }
0x17d1   :  { %v2217_v62 = vpop.f32.mrf.mxu0 }
0x17d2   :  { %v2218_v3 = vadd.f32 %v3587_v57, %v2217_v62  ;;  %v2138_v57 = vsub.f32 1.0, %v2815_v22 }
0x17d3   :  { %v2666_v36 = vpop.f32.mrf.mxu0 }
0x17d4   :  { %2222 = vrot.lane.b32.xlu1 %v2218_v3, %s2977_s1 }
0x1832   :  { %v2134_v24 = vpop.permute.xlu1 %2133 }
0x1833   :  { %v2136_v53 = vadd.f32 %v2134_v24, %v3171_v61 }
0x1835   :  { %2816 = vtanh.f32 %v2136_v53 }
0x1842   :  { %v2817_v4 = vpop.eup %2816 }
0x1843   :  { %2140 = vrot.lane.b32.xlu0 %v2817_v4, %s2977_s1 }
0x1846   :  { %v2223_v52 = vpop.permute.xlu1 %2222 }
0x1847   :  { %2239 = vrot.lane.b32.xlu0 %v2218_v3, %s2979_s16  ;;  %v2225_v7 = vadd.f32 %v2223_v52, %v3155_v47  ;;  %v2232_v44 = vadd.f32 %v2223_v52, %v3159_v50 }
0x1849   :  { %v2390_v27 = vmul.f32 -1.442695, %v2225_v7  ;;  %v2391_v21 = vmul.f32 -1.442695, %v2232_v44 }
0x184b   :  { %2818 = vpow2.f32 %v2390_v27 }
0x1858   :  { %v2819_v14 = vpop.eup %2818 }
0x1859   :  { %v2229_v8 = vadd.f32 1.0, %v2819_v14 }
0x185b   :  { %2820 = vrcp.f32 %v2229_v8 }
0x1868   :  { %v2821_v30 = vpop.eup %2820 }
0x18b5   :  { %v2141_v15 = vpop.permute.xlu0 %2140 }
0x18b6   :  { %v2143_v61 = vmul.f32 %v2141_v15, %v2138_v57 }
0x18b8   :  { %v2147_v17 = vadd.f32 %v2146_v29, %v2143_v61 }
0x18b9   :  { %v2240_v16 = vpop.permute.xlu0 %2239 }
0x18ba   :  { %v2242_v55 = vmul.f32 %v2821_v30, %v2240_v16  ;;  %v2267_v35 = vsub.f32 %v2147_v17, %v2144_v13  ;;  %v2258_v58 = vrot.slane %v2147_v17, 4 }
0x18bc   :  { %2244 = vrot.lane.b32.xlu0 %v2242_v55, %s2976_s12  ;;  %v2269_v40 = vrot.slane %v2267_v35, 4 }
0x18be   :  { %2270 = vrot.lane.b32.xlu1 %v2269_v40, %s2977_s1 }
0x192e   :  { %v2245_v47 = vpop.permute.xlu0 %2244 }
0x192f   :  { %v2247_v41 = vadd.f32 %v2245_v47, %v3159_v50 }
0x1930   :  { %v2271_v9 = vpop.permute.xlu1 %2270 }
0x1931   :  { %2822 = vtanh.f32 %v2247_v41  ;;  %v2273_v32 = vmul.f32 %v2271_v9, %v3275_v42 }
0x1932   :  { %2824 = vpow2.f32 %v2391_v21 }
0x1933   :  { %2275 = vrot.lane.b32.xlu1 %v2273_v32, %s2979_s16 }
0x1937   :  { %814 = vrot.lane.b32.xlu1 %v813_v33, %s2977_s1 }
0x193b   :  { %1784 = vrot.lane.b32.xlu1 %v1783_v43, %s2977_s1 }
0x193e   :  { %v2823_v10 = vpop.eup %2822 }
0x193f   :  { %2251 = vrot.lane.b32.xlu0 %v2823_v10, %s2977_s1  ;;  %577 = vrot.lane.b32.xlu1 %v3205_v19, %s2977_s1  ;;  %v2021_v19 = vmul.f32 %v3596_v26, %v3335_v0  ;;  %v2825_v2 = vpop.eup %2824 }
0x1940   :  { %v2236_v39 = vadd.f32 1.0, %v2825_v2 }
0x1942   :  { %2826 = vrcp.f32 %v2236_v39 }
0x1943   :  { %1305 = vrot.lane.b32.xlu0 %v1304_v34, %s2977_s1  ;;  %1548 = vrot.lane.b32.xlu1 %v1546_v37, %s2977_s1 }
0x1947   :  { %2259 = vrot.lane.b32.xlu0 %v2258_v58, %s2977_s1 }
0x194b   :  { %1061 = vrot.lane.b32.xlu0 %v1059_v48, %s2977_s1 }
0x194f   :  { %2023 = vrot.lane.b32.xlu0 %v2021_v19, %s2977_s1  ;;  %v2827_v0 = vpop.eup %2826 }
0x1950   :  { %v2249_v50 = vsub.f32 1.0, %v2827_v0  ;;  %v2255_v20 = vmul.f32 %v2827_v0, %v3616_v49 }
0x19a5   :  { %v2276_v11 = vpop.permute.xlu1 %2275 }
0x19a6   :  { %v2278_v46 = vadd.f32 %v2276_v11, %v3603_v25 }
0x19a8   :  { %2283 = vrot.lane.b32.xlu1 %v2278_v46, %s2977_s1 }
0x19a9   :  { %v815_v23 = vpop.permute.xlu1 %814 }
0x19aa   :  { %v817_v38 = vmul.f32 %v815_v23, %v3246_v63 }
0x19ac   :  { %819 = vst.msk [vmem:[#allocation8 + $0x4] sm:$0xf] %vm580_vm9, %v817_v38 }
0x19ad   :  { %v1785_v26 = vpop.permute.xlu1 %1784 }
0x19ae   :  { %v1787_v12 = vmul.f32 %v1785_v26, %v3382_v45 }
0x19b0   :  { %1789 = vst.msk [vmem:[#allocation8 + $0x14] sm:$0xf] %vm580_vm9, %v1787_v12 }
0x19b1   :  { %v2252_v1 = vpop.permute.xlu0 %2251  ;;  %v578_v6 = vpop.permute.xlu1 %577 }
0x19b2   :  { %v2254_v5 = vmul.f32 %v2252_v1, %v2249_v50  ;;  %581 = vst.msk [vmem:[#allocation8] sm:$0xf] %vm580_vm9, %v578_v6 }
0x19b4   :  { %v2256_v25 = vadd.f32 %v2255_v20, %v2254_v5 }
0x19b5   :  { %v1306_v63 = vpop.permute.xlu0 %1305  ;;  %v1549_v59 = vpop.permute.xlu1 %1548 }
0x19b6   :  { %v2265_v54 = vmul.f32 %v2256_v25, %v3201_v18  ;;  %v2279_v56 = vsub.f32 %v2256_v25, %v3616_v49  ;;  %v1308_v45 = vmul.f32 %v1306_v63, %v3377_v28  ;;  %1552 = vst.msk [vmem:[#allocation8 + $0x10] sm:$0xf] %vm580_vm9, %v1549_v59 }
0x19b8   :  { %2266 = vst.msk [vmem:[#allocation9] sm:$0xf] %vm580_vm9, %v2265_v54  ;;  %v2280_v51 = vmul.f32 %v2279_v56, %v3201_v18  ;;  %1310 = vst.msk [vmem:[#allocation8 + $0xc] sm:$0xf] %vm580_vm9, %v1308_v45 }
0x19b9   :  { %v2260_v22 = vpop.permute.xlu0 %2259 }
0x19ba   :  { %2909 = shalt.err (!%p2906_p5)
}
0x19bb   :  { %s2987_s27 = smov 4   ;;  %v2281_v18 = vadd.f32 %v2280_v51, %v3616_v49  ;;  %v2262_v28 = vmul.f32 %v2260_v22, %v3275_v42  ;;  %s2988_s30 = smov [#allocation8]  }
0x19bc   :  { %2312 = dma.vmem_to_hbm [thread:$0]  %s2307_s25, 512, %s3706_s10, [#allocation10], %s2976_s12, %s2976_s12, %s2987_s27  }
0x19bd   :  { %2288 = vst.msk [vmem:[#allocation11 + $0x4] sm:$0xf] %vm580_vm9, %v2281_v18  ;;  %2264 = vst.msk [vmem:[#allocation8 + $0x1c] sm:$0xf] %vm580_vm9, %v2262_v28  ;;  %v1062_v31 = vpop.permute.xlu0 %1061  ;;  %s2294_s13 = sshll.u32 %s2988_s30, 4  ;;  %s2295_s13 = int_to_ptr.vmem [resolvable:$true] %s2294_s13 }
0x19be   :  { %1065 = vst.msk [vmem:[#allocation8 + $0x8] sm:$0xf] %vm580_vm9, %v1062_v31  ;;  %s2918_s3 = scalar_lea.vmem %s2295_s13, 512  ;;  %p2923_p7 = scmp.lt.s32.totalorder %s2295_s13, %s2295_s13 }
0x19bf   :  { %p2919_p6 = scmp.ne.s32.totalorder %s2295_s13, %s2918_s3  ;;  %p2924_p8 = scmp.lt.s32.totalorder %s2918_s3, %s2918_s3 }
0x19c1   :  { %v2024_v60 = vpop.permute.xlu0 %2023  ;;  %p2925_p9 = por %p2924_p8, %p2923_p7 }
0x19c2   :  { %2027 = vst.msk [vmem:[#allocation8 + $0x18] sm:$0xf] %vm580_vm9, %v2024_v60 }
0x19c3   :  { %p2926_p10 = pnand %p2925_p9, %p2919_p6 }
0x19c5   :  { %2929 = shalt.err (!%p2926_p10)
}
0x19c6   :  { %2300 = dma.vmem_to_hbm [thread:$0]  %s2295_s13, 512, %s3705_s9, [#allocation4], %s2976_s12, %s2976_s12, %s2987_s27  }
0x19c7   :  { %s2989_s15 = smov [#allocation11]  }
0x19c8   :  { %s2318_s1 = sshll.u32 %s2989_s15, 4  ;;  %s2319_s1 = int_to_ptr.vmem [resolvable:$true] %s2318_s1 }
0x19c9   :  { %s2938_s4 = scalar_lea.vmem %s2319_s1, 128  ;;  %p2943_p12 = scmp.lt.s32.totalorder %s2319_s1, %s2319_s1 }
0x19ca   :  { %p2939_p11 = scmp.ne.s32.totalorder %s2319_s1, %s2938_s4  ;;  %p2944_p13 = scmp.lt.s32.totalorder %s2938_s4, %s2938_s4 }
0x19cc   :  { %p2945_p0 = por %p2944_p13, %p2943_p12 }
0x19ce   :  { %p2946_p1 = pnand %p2945_p0, %p2939_p11 }
0x1a1a   :  { %v2284_v42 = vpop.permute.xlu1 %2283 }
0x1a1b   :  { %2286 = vst.msk [vmem:[#allocation11] sm:$0xf] %vm580_vm9, %v2284_v42 }
0x1a1c   :  { %2949 = shalt.err (!%p2946_p1)
}
0x1a1d   :  { %2324 = dma.vmem_to_hbm [thread:$0]  %s2319_s1, 128, %s3707_s11, [#allocation10], %s2976_s12, %s2976_s12, %s2987_s27  }
0x1a1e   :  { %2962 = dma.done.wait [#allocation4], 512  }
0x1a1f   :  { %2963 = vsyncadd [#allocation4], 4294966784 }
0x1a20   :  { %2964 = dma.done.wait [#allocation10], 640  }
0x1a21   :  { %2965 = vsyncadd [#allocation10], 4294966656 }
0x1a22   :  { %2334 = vsyncpa [#allocation3], 1 }
0x1a23   :  { %2335 = vsyncpa [#allocation6], 1 }
0x1a24   :  { %2336 = vsyncpa [#allocation4], 1 }
0x1a25   :  { %2337 = vsyncpa [#allocation10], 1 }

</bundles_post_ra>
